<compile_context>
chip_gen: v6e
topology: v6e:2x2x1
jax: 0.10.0
libtpu: 0.0.40
codegen_flags: <defaults>
</compile_context>

<pallas_src>
import jax
import jax.numpy as jnp
from jax.experimental import pallas as pl
from jax.experimental.pallas import tpu as pltpu


DILATIONS = (1, 2, 4, 8)
# Union of temporal tap offsets (kt-1)*d needed by the four dilation branches.
OFFSETS = (-8, -4, -2, -1, 0, 1, 2, 4, 8)
PAD_T = 8                      # max |offset|; temporal zero-padding on each side


# --------------------------------------------------------------------------------------
# Pallas kernel: one row tile = one K=243 MXU matmul + bias + ReLU epilogue
# --------------------------------------------------------------------------------------
def _fused_ddcnn_kernel(p_ref, w_ref, b_ref, o_ref):
    """p_ref: [1, TR, K]  bf16   (im2col'ed rows: 9 temporal offsets x 9 spatial x Cin)
       w_ref: [K, 4*Cout] bf16   (block-sparse fused weights for all 4 dilations)
       b_ref: [1, 4*Cout] f32
       o_ref: [1, TR, 4*Cout] f32
    Single MXU contraction per tile (accumulation lives inside the MXU), then a
    f32 bias + ReLU epilogue and one lane-dense store."""
    acc = jnp.dot(p_ref[0], w_ref[...], preferred_element_type=jnp.float32)
    o_ref[0] = jnp.maximum(acc + b_ref[...], 0.0)


# --------------------------------------------------------------------------------------
# One-time parameter packing (hoisted out of the per-forward jit)
# --------------------------------------------------------------------------------------
def pack_dilated_dcnn_params(weights, biases):
    """weights[d]: [Cout, Cin, 3, 3, 3]; biases[d]: [Cout].
    Returns (wbig [9*9*Cin, 4*Cout] bf16, bias [1, 4*Cout] f32).
    Column block di*Cout:(di+1)*Cout holds dilation d's weights; within it only
    the temporal-offset row blocks {-d, 0, d} are nonzero."""
    Cout, Cin = weights[DILATIONS[0]].shape[:2]
    Ksp = 9 * Cin                                  # spatial taps x input channels
    K = len(OFFSETS) * Ksp
    M = len(DILATIONS) * Cout
    wbig = jnp.zeros((K, M), jnp.float32)
    for di, d in enumerate(DILATIONS):
        # torch (co, ci, kt, kh, kw) -> (kt, kh, kw, ci, co) -> (3, 9*Cin, Cout)
        wt = jnp.transpose(weights[d], (2, 3, 4, 1, 0)).reshape(3, Ksp, Cout)
        for kt in range(3):
            s = OFFSETS.index((kt - 1) * d)
            wbig = wbig.at[s * Ksp:(s + 1) * Ksp,
                           di * Cout:(di + 1) * Cout].set(wt[kt])
    bias = jnp.concatenate([biases[d] for d in DILATIONS]).reshape(1, M)
    return wbig.astype(jnp.bfloat16), bias.astype(jnp.float32)


def _pick_row_tile(n_rows, target=1024):
    """Largest sublane-aligned divisor of n_rows not above `target`."""
    cand = target
    while cand >= 8:
        if cand <= n_rows and n_rows % cand == 0:
            return cand
        cand //= 2
    return n_rows


# --------------------------------------------------------------------------------------
# Wrapper: layout plumbing + im2col (JAX glue) around the fused kernel
# --------------------------------------------------------------------------------------
def fused_dilated_dcnn(x, wbig, bias, *, row_tile=1024):
    """x: [B, Cin, T, H, W] f32 (torch NCDHW); wbig/bias from pack_dilated_dcnn_params.
       Returns [B, 4*Cout, T, H, W] f32, equal to
       torch.cat([relu(conv3d_d(x)) for d in (1,2,4,8)], dim=1)."""
    B, Cin, T, H, W = x.shape
    K, M = wbig.shape
    HW = H * W
    R = T * HW                                     # output rows per batch element
    TR = _pick_row_tile(R, row_tile)

    # ---- JAX glue: NCDHW -> channels-last, zero-pad, im2col over the union of taps ----
    xl = jnp.transpose(x, (0, 2, 3, 4, 1))                                  # [B,T,H,W,Cin]
    xp = jnp.pad(xl, ((0, 0), (PAD_T, PAD_T), (1, 1), (1, 1), (0, 0)))
    xp = xp.astype(jnp.bfloat16)
    taps = [xp[:, PAD_T + off:PAD_T + off + T, kh:kh + H, kw:kw + W, :]
            for off in OFFSETS for kh in range(3) for kw in range(3)]
    patches = jnp.concatenate(taps, axis=-1).reshape(B, R, K)               # [B, R, 243]

    out = pl.pallas_call(
        _fused_ddcnn_kernel,
        out_shape=jax.ShapeDtypeStruct((B, R, M), jnp.float32),
        grid_spec=pltpu.PrefetchScalarGridSpec(
            num_scalar_prefetch=0,
            grid=(B, R // TR),
            in_specs=[
                pl.BlockSpec((1, TR, K), lambda b, t: (b, t, 0)),
                pl.BlockSpec((K, M), lambda b, t: (0, 0)),
                pl.BlockSpec((1, M), lambda b, t: (0, 0)),
            ],
            out_specs=pl.BlockSpec((1, TR, M), lambda b, t: (b, t, 0)),
        ),
        compiler_params=pltpu.CompilerParams(
            dimension_semantics=("parallel", "parallel"),
            # Per-step footprint (double-buffered patch tile + out tile + weights)
            # is ~1.5 MiB at these shapes; 16 MiB cap fits every chip's scoped VMEM.
            vmem_limit_bytes=16 * 1024 * 1024,
        ),
    )(patches, wbig, bias)

    out = out.reshape(B, T, H, W, M)
    return jnp.transpose(out, (0, 4, 1, 2, 3))                              # back to NCDHW


# --------------------------------------------------------------------------------------
# Pure-JAX reference (matches nn.Conv3d exactly) for a correctness check
# --------------------------------------------------------------------------------------
def ref_dilated_dcnn(x, weights, biases):
    outs = []
    for d in DILATIONS:
        y = jax.lax.conv_general_dilated(
            x, weights[d],
            window_strides=(1, 1, 1),
            padding=((d, d), (1, 1), (1, 1)),
            rhs_dilation=(d, 1, 1),
            dimension_numbers=("NCDHW", "OIDHW", "NCDHW"),
        )
        outs.append(jax.nn.relu(y + biases[d].reshape(1, -1, 1, 1, 1)))
    return jnp.concatenate(outs, axis=1)


if __name__ == "__main__":
    # Small shapes consistent with the module's first block:
    # in_filters=3 (RGB), filters=32 per dilation -> concat = 128 channels (lane-dense).
    B, Cin, T, H, W = 2, 3, 16, 16, 16
    filters = 32

    key = jax.random.PRNGKey(0)
    kx, *kws = jax.random.split(key, 1 + 2 * len(DILATIONS))
    x = jax.random.normal(kx, (B, Cin, T, H, W), dtype=jnp.float32)
    weights, biases = {}, {}
    for i, d in enumerate(DILATIONS):
        weights[d] = 0.1 * jax.random.normal(kws[2 * i], (filters, Cin, 3, 3, 3),
                                             dtype=jnp.float32)
        biases[d] = 0.1 * jax.random.normal(kws[2 * i + 1], (filters,), dtype=jnp.float32)

    # One-time weight packing (hoisted out of the per-forward path).
    wbig, bfused = pack_dilated_dcnn_params(weights, biases)

    fwd = jax.jit(fused_dilated_dcnn)
    out = jax.block_until_ready(fwd(x, wbig, bfused))
    assert out.shape == (B, 4 * filters, T, H, W), out.shape

    # Correctness check vs XLA conv (tolerant of bf16 MXU operands, f32 accumulation).
    ref = jax.block_until_ready(jax.jit(ref_dilated_dcnn)(x, weights, biases))
    rel_err = jnp.linalg.norm(out - ref) / (jnp.linalg.norm(ref) + 1e-6)
    assert float(rel_err) < 3e-2, float(rel_err)

    print("KERNEL_OK")
</pallas_src>

<mosaic_0001>
module attributes {stable_mosaic.version = 11 : i64} {
  func.func @_fused_ddcnn_kernel(%arg0: i32, %arg1: i32, %arg2: memref<1x1024x243xbf16, #tpu.memory_space<vmem>>, %arg3: memref<243x128xbf16, #tpu.memory_space<vmem>>, %arg4: memref<1x128xf32, #tpu.memory_space<vmem>>, %arg5: memref<1x1024x128xf32, #tpu.memory_space<vmem>>) attributes {dimension_semantics = [#tpu.dimension_semantics<parallel>, #tpu.dimension_semantics<parallel>], iteration_bounds = array<i64: 2, 4>, scalar_prefetch = 0 : i64, scratch_operands = 0 : i64, tpu.core_type = #tpu.core_type<tc>, window_params = [{transform_indices = @transform_0, window_bounds = array<i64: 1, 1024, 243>}, {pipeline_mode = #tpu.pipeline_mode<synchronous>, transform_indices = @transform_1, window_bounds = array<i64: 243, 128>}, {pipeline_mode = #tpu.pipeline_mode<synchronous>, transform_indices = @transform_2, window_bounds = array<i64: 1, 128>}, {transform_indices = @transform_3, window_bounds = array<i64: 1, 1024, 128>}]} {
    %c0 = arith.constant 0 : index
    %c0_0 = arith.constant 0 : index
    %c0_1 = arith.constant 0 : index
    %0 = vector.load %arg2[%c0, %c0_0, %c0_1] : memref<1x1024x243xbf16, #tpu.memory_space<vmem>>, vector<1x1024x243xbf16>
    %1 = vector.shape_cast %0 : vector<1x1024x243xbf16> to vector<1024x243xbf16>
    %c0_2 = arith.constant 0 : index
    %c0_3 = arith.constant 0 : index
    %2 = vector.load %arg3[%c0_2, %c0_3] : memref<243x128xbf16, #tpu.memory_space<vmem>>, vector<243x128xbf16>
    %cst = arith.constant dense<0.000000e+00> : vector<1024x128xf32>
    %3 = tpu.matmul %1, %2, %cst {dimension_numbers = #tpu.dot_dimension_numbers<[1], [0], [0], [1], [0, 0, 1, 1], [], []>} : vector<1024x243xbf16>, vector<243x128xbf16>, vector<1024x128xf32> -> vector<1024x128xf32>
    %c0_4 = arith.constant 0 : index
    %c0_5 = arith.constant 0 : index
    %4 = vector.load %arg4[%c0_4, %c0_5] : memref<1x128xf32, #tpu.memory_space<vmem>>, vector<1x128xf32>
    %5 = vector.broadcast %4 : vector<1x128xf32> to vector<1024x128xf32>
    %6 = arith.addf %3, %5 : vector<1024x128xf32>
    %cst_6 = arith.constant 0.000000e+00 : f32
    %7 = vector.broadcast %cst_6 : f32 to vector<1024x128xf32>
    %8 = arith.maximumf %6, %7 : vector<1024x128xf32>
    %c0_7 = arith.constant 0 : index
    %c0_8 = arith.constant 0 : index
    %c0_9 = arith.constant 0 : index
    %9 = vector.load %arg5[%c0_7, %c0_8, %c0_9] : memref<1x1024x128xf32, #tpu.memory_space<vmem>>, vector<1x1024x128xf32>
    %10 = vector.shape_cast %9 : vector<1x1024x128xf32> to vector<1024x128xf32>
    %11 = vector.shape_cast %8 : vector<1024x128xf32> to vector<1x1024x128xf32>
    tpu.vector_store %arg5[%c0_7, %c0_8, %c0_9], %11 {strides = array<i32>} : memref<1x1024x128xf32, #tpu.memory_space<vmem>>, vector<1x1024x128xf32>,
    return
  }
  func.func @transform_0(%arg0: i32, %arg1: i32) -> (i32, i32, i32) {
    %c0_i32 = arith.constant 0 : i32
    %c0_i32_0 = arith.constant 0 : i32
    return %arg0, %arg1, %c0_i32 : i32, i32, i32
  }
  func.func @transform_1(%arg0: i32, %arg1: i32) -> (i32, i32) {
    %c0_i32 = arith.constant 0 : i32
    %c0_i32_0 = arith.constant 0 : i32
    %c0_i32_1 = arith.constant 0 : i32
    return %c0_i32, %c0_i32_0 : i32, i32
  }
  func.func @transform_2(%arg0: i32, %arg1: i32) -> (i32, i32) {
    %c0_i32 = arith.constant 0 : i32
    %c0_i32_0 = arith.constant 0 : i32
    %c0_i32_1 = arith.constant 0 : i32
    return %c0_i32, %c0_i32_0 : i32, i32
  }
  func.func @transform_3(%arg0: i32, %arg1: i32) -> (i32, i32, i32) {
    %c0_i32 = arith.constant 0 : i32
    %c0_i32_0 = arith.constant 0 : i32
    return %arg0, %arg1, %c0_i32 : i32, i32, i32
  }
}

</mosaic_0001>

<bundles_post_ra>
// kernel: fused_dilated_dcnn.1
= control target key start
LH: loop header
LB: loop body
LE: loop exit
PB: predicated region body
PF: predicated region fallthrough
CT: control target
= control target key end

     0   :  { %8 = vsyncpa [#allocation3], 0  ;;  %s3490_s0 = inlined_call_operand.vmem [shape: bf16[2,4096,243], index: 0, kind: input, shape index: {}]   ;;  %s3491_s1 = inlined_call_operand.vmem [shape: bf16[243,128], index: 1, kind: input, shape index: {}]   ;;  %s3492_s2 = inlined_call_operand.vmem [shape: f32[1,128], index: 2, kind: input, shape index: {}]   ;;  %s3493_s3 = inlined_call_operand.hbm [shape: f32[2,4096,128], index: 3, kind: output, shape index: {}]  }
   0x1   :  { %10 = vsyncpa [#allocation3 + $0x1], 0  ;;  %s2801_s12 = smov 0   ;;  %s2803_s13 = smov 0  }
   0x2   :  { %s2805_s14 = smov 0   ;;  %s2807_s15 = smov 0  }
   0x3   :  { %s2809_s16 = smov 0   ;;  %s2811_s17 = smov 0  }
   0x4   :  { %s2813_s18 = smov 0   ;;  %s2815_s19 = smov 0  }
   0x5 LB: > { %s2141_s20 = sadd.s32 4294967295, %s2774_s19   ;;  %s2142_s21 = sadd.s32 4294967294, %s2774_s19   ;;  %s2774_s19 = sphi %s2815_s19, %s16_s19   ;;  %s2770_s18 = sphi %s2813_s18, %s3502_s18   ;;  %s2766_s17 = sphi %s2811_s17, %s3501_s17   ;;  %s2762_s16 = sphi %s2809_s16, %s3500_s16   ;;  %s2758_s15 = sphi %s2807_s15, %s3499_s15   ;;  %s2754_s14 = sphi %s2805_s14, %s3498_s14   ;;  %s2750_s13 = sphi %s2803_s13, %s3497_s13   ;;  %s2746_s12 = sphi %s2801_s12, %s3496_s12  }
   0x6   : > { %s25_s22 = sadd.s32 1, %s2766_s17  ;;  %s28_s23 = sadd.s32 1, %s2770_s18 }
   0x7   : > { %p26_p0 = scmp.ge.s32.totalorder %s25_s22, 4  ;;  %p117_p1 = scmp.ne.s32.totalorder %s2754_s14, %s2750_s13 }
   0x8   : > { %p118_p2 = scmp.eq.s32.totalorder %s2141_s20, 7  ;;  %p123_p5 = scmp.ne.s32.totalorder %s2750_s13, %s2746_s12 }
   0x9   : > { %s3504_s22 = smov (%p26_p0, %s25_s22), 0  ;;  %s3506_s23 = smov (!%p26_p0, %s28_s23), %s2770_s18 }
   0xa   : > { %s103_s24 = ssub.s32 %s2766_s17, %s3504_s22  ;;  %p2852_p3 = por %p118_p2, %p117_p1 }
   0xb   : > { %p30_p4 = scmp.ge.s32.totalorder %s3506_s23, 2  ;;  %p124_p6 = scmp.eq.s32.totalorder %s2142_s21, 7 }
   0xc   : > { %p2145_p7 = scmp.ge.s32.totalorder %s2774_s19, 1  ;;  %p162_p9 = scmp.lt.s32.totalorder %s2774_s19, 9 }
   0xd   : > { %s3508_s23 = smov (%p30_p4, %s3506_s23), 0  ;;  %p2861_p8 = por %p124_p6, %p123_p5 }
   0xe   : > { %s102_s27 = ssub.s32 %s2770_s18, %s3508_s23  ;;  %s107_s28 = sadd.s32 1, %s2754_s14 }
   0xf   : > { %s104_s29 = sor.u32 %s103_s24, %s102_s27  ;;  %p163_p10 = pnand %p2145_p7, %p162_p9 }
  0x10   : > { %p105_p11 = scmp.eq.s32.totalorder %s104_s29, 0  ;;  %p192_p12 = scmp.lt.s32.totalorder (!%p163_p10), %s2762_s16, 1 }
  0x11   : > { %166 = sbr.rel (%p163_p10) target bundleno = 550 (0x226), region = 32  ;;  %s2889_s10 = sshll.u32 (!%p163_p10), %s2758_s15, 7 }
  0x12   : > { %s2870_s30 = scalar_select %p105_p11, %s2754_s14, %s107_s28  }
  0x13   : > { %p194_p13 = scmp.lt.s32.totalorder (!%p163_p10), %s2889_s10, 511  ;;  %s2362_s20 = sshll.u32 (!%p163_p10), %s2762_s16, 9 }
  0x16   : > { %v2473_v0 = vld [vmem:[%s3491_s1 + $0x38] sm:$0xff]   ;;  %v2776_v1 = vmov 0   ;;  %v2474_v2 = vld [vmem:[%s3491_s1 + $0x30] sm:$0xff]   ;;  %v2475_v3 = vld [vmem:[%s3491_s1 + $0x28] sm:$0xff]   ;;  %s193_s21 = scalar_select %p192_p12, %s2762_s16, 1  ;;  %vm1232_vm0 = vcmask 1040384  }
  0x17   : > { %1239 = vmatprep.subr.bf16.mxu0 %v2776_v1  ;;  %2366 = vmatprep.subr.bf16.mxu1 %v2776_v1  ;;  %v2476_v4 = vld [vmem:[%s3491_s1 + $0x20] sm:$0xff]   ;;  %s195_s27 = scalar_select %p194_p13, %s2889_s10, 511  ;;  %v2477_v5 = vld [vmem:[%s3491_s1 + $0x18] sm:$0xff]   ;;  %v2478_v6 = vld [vmem:[%s3491_s1 + $0x10] sm:$0xff]   ;;  %vm1039_vm1 = vcmask 941056   ;;  %vm1233_vm2 = vcmask 1041408  }
  0x18   : > { %1240 = vmatpush1.bf16.msra.mxu0 %v2473_v0  ;;  %2382 = vmatpush1.bf16.msra.mxu1 %v2473_v0  ;;  %s2149_s24 = sshll.u32 %s193_s21, 10  ;;  %v2479_v9 = vld [vmem:[%s3491_s1 + $0x8] sm:$0xff]   ;;  %v2777_v10 = vmov 65535   ;;  %v2480_v12 = vld [vmem:[%s3491_s1] sm:$0xff]   ;;  %v2482_v16 = vld [vmem:[%s3491_s1 + $0x70] sm:$0xff]   ;;  %s2053_s21 = sadd.s32 %s2362_s20, %s2889_s10 }
  0x19   : > { %1241 = vmatprep.subr.bf16.mxu0 %v2776_v1  ;;  %2367 = vmatprep.subr.bf16.mxu1 %v2776_v1  ;;  %s2148_s29 = sshll.u32 %s195_s27, 1  ;;  %v1234_v11 = vsel %vm1232_vm0, 4294967295, %v2777_v10  ;;  %v2481_v13 = vld [vmem:[%s3491_s1 + $0x78] ss:$0 sps:$4 sm:$0x33]   ;;  %v2483_v17 = vld [vmem:[%s3491_s1 + $0x68] sm:$0xff]  }
  0x1a   : > { %s198_s4 = sadd.s32 %s2149_s24, %s2148_s29  ;;  %v1235_v14 = vsel %vm1233_vm2, %v1234_v11, 0  ;;  %v2484_v18 = vld [vmem:[%s3491_s1 + $0x60] sm:$0xff]   ;;  %v2485_v19 = vld [vmem:[%s3491_s1 + $0x58] sm:$0xff]   ;;  %v2486_v20 = vld [vmem:[%s3491_s1 + $0x50] sm:$0xff]   ;;  %s2363_s16 = sshll.u32 %s2053_s21, 7 }
  0x1b   : > { %s2150_s5 = sshll.u32 %s198_s4, 2  ;;  %v1237_v15 = vand.u32 %v2481_v13, %v1235_v14  ;;  %v2487_v21 = vld [vmem:[%s3491_s1 + $0x48] sm:$0xff]   ;;  %v2488_v22 = vld [vmem:[%s3491_s1 + $0x40] sm:$0xff]   ;;  %s188_s4 = sand.u32 1, %s2750_s13  }
  0x1c   : > { %1242 = vmatpush1.bf16.msra.mxu0 %v2474_v2  ;;  %2383 = vmatpush1.bf16.msra.mxu1 %v2474_v2  ;;  %s2910_s11 = scalar_lea.vmem %s3490_s0, %s2150_s5  ;;  %s2146_s7 = sshll.u32 %s188_s4, 10 }
  0x1d   : > { %1243 = vmatprep.subr.bf16.mxu0 %v2776_v1  ;;  %2368 = vmatprep.subr.bf16.mxu1 %v2776_v1  ;;  %v2491_v7 = vld [vmem:[%s2910_s11 + $0x4] ss:$8 sps:$4 sm:$0xff]   ;;  %v2489_v23 = vld [vmem:[%s2910_s11] ss:$8 sps:$4 sm:$0xff]   ;;  %v2495_v25 = vld [vmem:[%s2910_s11 + $0x14] ss:$8 sps:$4 sm:$0xff]   ;;  %s3427_s15 = scalar_lea.hbm %s3493_s3, %s2363_s16 }
  0x1e   : > { %v2494_v8 = vld [vmem:[%s2910_s11 + $0x204] ss:$8 sps:$4 sm:$0xff]   ;;  %2296 = vmatprep.mubr.msk.bf16.mxu0 %vm1039_vm1, %v2491_v7  ;;  %v2492_v24 = vld [vmem:[%s2910_s11 + $0x200] ss:$8 sps:$4 sm:$0xff]   ;;  %v2497_v26 = vld [vmem:[%s2910_s11 + $0x214] ss:$8 sps:$4 sm:$0xff]  }
  0x1f   : > { %2328 = vmatprep.mubr.msk.bf16.mxu1 %vm1039_vm1, %v2494_v8  ;;  %v2499_v27 = vld [vmem:[%s2910_s11 + $0x10] ss:$8 sps:$4 sm:$0xff]   ;;  %v2501_v29 = vld [vmem:[%s2910_s11 + $0x24] ss:$8 sps:$4 sm:$0xff]   ;;  %v2505_v31 = vld [vmem:[%s2910_s11 + $0x20] ss:$8 sps:$4 sm:$0xff]  }
  0x20   : > { %1244 = vmatpush1.bf16.msra.mxu0 %v2475_v3  ;;  %2384 = vmatpush1.bf16.msra.mxu1 %v2475_v3  ;;  %v2500_v28 = vld [vmem:[%s2910_s11 + $0x210] ss:$8 sps:$4 sm:$0xff]   ;;  %v2503_v30 = vld [vmem:[%s2910_s11 + $0x224] ss:$8 sps:$4 sm:$0xff]   ;;  %v2506_v32 = vld [vmem:[%s2910_s11 + $0x220] ss:$8 sps:$4 sm:$0xff]  }
  0x21   : > { %1245 = vmatprep.subr.bf16.mxu0 %v2776_v1  ;;  %2369 = vmatprep.subr.bf16.mxu1 %v2776_v1  ;;  %v2507_v33 = vld [vmem:[%s2910_s11 + $0x34] ss:$8 sps:$4 sm:$0xff]   ;;  %v2511_v35 = vld [vmem:[%s2910_s11 + $0x30] ss:$8 sps:$4 sm:$0xff]   ;;  %v2513_v37 = vld [vmem:[%s2910_s11 + $0x44] ss:$8 sps:$4 sm:$0xff]  }
  0x22   : > { %v2509_v34 = vld [vmem:[%s2910_s11 + $0x234] ss:$8 sps:$4 sm:$0xff]   ;;  %v2512_v36 = vld [vmem:[%s2910_s11 + $0x230] ss:$8 sps:$4 sm:$0xff]   ;;  %v2515_v38 = vld [vmem:[%s2910_s11 + $0x244] ss:$8 sps:$4 sm:$0xff]  }
  0x23   : > { %v2517_v39 = vld [vmem:[%s2910_s11 + $0x40] ss:$8 sps:$4 sm:$0xff]   ;;  %v2519_v41 = vld [vmem:[%s2910_s11 + $0x54] ss:$8 sps:$4 sm:$0xff]   ;;  %v2523_v43 = vld [vmem:[%s2910_s11 + $0x50] ss:$8 sps:$4 sm:$0xff]  }
  0x24   : > { %1246 = vmatpush1.bf16.msra.mxu0 %v2476_v4  ;;  %2385 = vmatpush1.bf16.msra.mxu1 %v2476_v4  ;;  %v2518_v40 = vld [vmem:[%s2910_s11 + $0x240] ss:$8 sps:$4 sm:$0xff]   ;;  %v2521_v42 = vld [vmem:[%s2910_s11 + $0x254] ss:$8 sps:$4 sm:$0xff]   ;;  %v2524_v44 = vld [vmem:[%s2910_s11 + $0x250] ss:$8 sps:$4 sm:$0xff]  }
  0x25   : > { %1247 = vmatprep.subr.bf16.mxu0 %v2776_v1  ;;  %2370 = vmatprep.subr.bf16.mxu1 %v2776_v1  ;;  %v2525_v45 = vld [vmem:[%s2910_s11 + $0x64] ss:$8 sps:$4 sm:$0xff]   ;;  %v2529_v47 = vld [vmem:[%s2910_s11 + $0x60] ss:$8 sps:$4 sm:$0xff]   ;;  %v2531_v49 = vld [vmem:[%s2910_s11 + $0x74] ss:$8 sps:$4 sm:$0xff]  }
  0x26   : > { %v2527_v46 = vld [vmem:[%s2910_s11 + $0x264] ss:$8 sps:$4 sm:$0xff]   ;;  %v2530_v48 = vld [vmem:[%s2910_s11 + $0x260] ss:$8 sps:$4 sm:$0xff]   ;;  %v2533_v50 = vld [vmem:[%s2910_s11 + $0x274] ss:$8 sps:$4 sm:$0xff]  }
  0x27   : > { %v2535_v51 = vld [vmem:[%s2910_s11 + $0x70] ss:$8 sps:$4 sm:$0xff]   ;;  %v2537_v53 = vld [vmem:[%s2910_s11 + $0x84] ss:$8 sps:$4 sm:$0xff]   ;;  %v2541_v55 = vld [vmem:[%s2910_s11 + $0x80] ss:$8 sps:$4 sm:$0xff]  }
  0x28   : > { %1248 = vmatpush1.bf16.msra.mxu0 %v2477_v5  ;;  %2386 = vmatpush1.bf16.msra.mxu1 %v2477_v5  ;;  %v2536_v52 = vld [vmem:[%s2910_s11 + $0x270] ss:$8 sps:$4 sm:$0xff]   ;;  %v2539_v54 = vld [vmem:[%s2910_s11 + $0x284] ss:$8 sps:$4 sm:$0xff]   ;;  %v2542_v56 = vld [vmem:[%s2910_s11 + $0x280] ss:$8 sps:$4 sm:$0xff]  }
  0x29   : > { %1249 = vmatprep.subr.bf16.mxu0 %v2776_v1  ;;  %2371 = vmatprep.subr.bf16.mxu1 %v2776_v1  ;;  %v2543_v57 = vld [vmem:[%s2910_s11 + $0x94] ss:$8 sps:$4 sm:$0xff]   ;;  %v2547_v59 = vld [vmem:[%s2910_s11 + $0x90] ss:$8 sps:$4 sm:$0xff]   ;;  %v2549_v61 = vld [vmem:[%s2910_s11 + $0xa4] ss:$8 sps:$4 sm:$0xff]  }
  0x2a   : > { %v2545_v58 = vld [vmem:[%s2910_s11 + $0x294] ss:$8 sps:$4 sm:$0xff]   ;;  %v2548_v60 = vld [vmem:[%s2910_s11 + $0x290] ss:$8 sps:$4 sm:$0xff]   ;;  %v2551_v62 = vld [vmem:[%s2910_s11 + $0x2a4] ss:$8 sps:$4 sm:$0xff]  }
  0x2b   : > { %v2553_v63 = vld [vmem:[%s2910_s11 + $0xa0] ss:$8 sps:$4 sm:$0xff]   ;;  %v2557_v2 = vld [vmem:[%s2910_s11 + $0x2b4] ss:$8 sps:$4 sm:$0xff]   ;;  %v2559_v3 = vld [vmem:[%s2910_s11 + $0xb0] ss:$8 sps:$4 sm:$0xff]  }
  0x2c   : > { %1250 = vmatpush1.bf16.msra.mxu0 %v2478_v6  ;;  %2387 = vmatpush1.bf16.msra.mxu1 %v2478_v6  ;;  %v2554_v0 = vld [vmem:[%s2910_s11 + $0x2a0] ss:$8 sps:$4 sm:$0xff]   ;;  %v2560_v4 = vld [vmem:[%s2910_s11 + $0x2b0] ss:$8 sps:$4 sm:$0xff]   ;;  %v2561_v5 = vld [vmem:[%s2910_s11 + $0xc4] ss:$8 sps:$4 sm:$0xff]  }
  0x2d   : > { %1251 = vmatprep.subr.bf16.mxu0 %v2776_v1  ;;  %2372 = vmatprep.subr.bf16.mxu1 %v2776_v1  ;;  %v2563_v6 = vld [vmem:[%s2910_s11 + $0x2c4] ss:$8 sps:$4 sm:$0xff]   ;;  %v2565_v7 = vld [vmem:[%s2910_s11 + $0xc0] ss:$8 sps:$4 sm:$0xff]   ;;  %v2569_v10 = vld [vmem:[%s2910_s11 + $0x2d4] ss:$8 sps:$4 sm:$0xff]  }
  0x2e   : > { %v2566_v8 = vld [vmem:[%s2910_s11 + $0x2c0] ss:$8 sps:$4 sm:$0xff]   ;;  %v2571_v11 = vld [vmem:[%s2910_s11 + $0xd0] ss:$8 sps:$4 sm:$0xff]   ;;  %v2573_v13 = vld [vmem:[%s2910_s11 + $0xe4] ss:$8 sps:$4 sm:$0xff]  }
  0x2f   : > { %v2575_v14 = vld [vmem:[%s2910_s11 + $0x2e4] ss:$8 sps:$4 sm:$0xff]   ;;  %s3130_s8 = scalar_lea.vmem [#allocation2], %s2146_s7  ;;  %s3439_s28 = scalar_lea.sflag [#allocation3], %s188_s4 }
  0x30   : > { %1252 = vmatpush1.bf16.msra.mxu0 %v2479_v9  ;;  %2388 = vmatpush1.bf16.msra.mxu1 %v2479_v9  ;;  %v2567_v9 = vld [vmem:[%s2910_s11 + $0xd4] ss:$8 sps:$4 sm:$0xff]   ;;  %s2056_s10 = sshll.u32 %s3130_s8, 4  ;;  %s2778_s5 = smov [#allocation2]   ;;  %s3433_s10 = int_to_ptr.vmem [resolvable:$true] %s2056_s10 }
  0x31   : > { %1253 = vmatprep.subr.bf16.mxu0 %v2776_v1  ;;  %2373 = vmatprep.subr.bf16.mxu1 %v2776_v1  ;;  %s2682_s29 = scalar_lea.vmem %s3433_s10, 16384  ;;  %s2686_s6 = sshll.u32 %s2778_s5, 4  ;;  %s2687_s6 = int_to_ptr.vmem [resolvable:$false] %s2686_s6 }
  0x32   : > { %p2683_p0 = scmp.ne.s32.totalorder %s3433_s10, %s2682_s29  ;;  %s2688_s7 = scalar_lea.vmem %s2687_s6, 32768 }
  0x33   : > { %p2689_p4 = scmp.lt.s32.totalorder %s3433_s10, %s2687_s6  ;;  %p2690_p5 = scmp.lt.s32.totalorder %s2688_s7, %s2682_s29 }
  0x34   : > { %1254 = vmatpush1.bf16.msra.mxu0 %v2480_v12  ;;  %2389 = vmatpush1.bf16.msra.mxu1 %v2480_v12  ;;  %v2572_v12 = vld [vmem:[%s2910_s11 + $0x2d0] ss:$8 sps:$4 sm:$0xff]   ;;  %p2684_p1 = pnand %p2683_p0, %p2852_p3 }
  0x35   : > { %1255 = vmatprep.subr.bf16.mxu0 %v2776_v1  ;;  %2374 = vmatprep.subr.bf16.mxu1 %v2776_v1  ;;  %p2691_p6 = por %p2690_p5, %p2689_p4 }
  0x36   : > { %p2685_p2 = pneg %p2684_p1 }
  0x38   : > { %1256 = vmatpush2.bf16.msra.mxu0 %v1237_v15  ;;  %2390 = vmatpush2.bf16.msra.mxu1 %v1237_v15  ;;  %v2577_v15 = vld [vmem:[%s2910_s11 + $0xe0] ss:$8 sps:$4 sm:$0xff]   ;;  %p2692_p7 = pnand %p2691_p6, %p2685_p2 }
  0x39   : > { %1257 = vmatprep.subr.bf16.mxu0 %v2776_v1  ;;  %2375 = vmatprep.subr.bf16.mxu1 %v2776_v1 }
  0x3c   : > { %1258 = vmatpush2.bf16.msra.mxu0 %v2482_v16  ;;  %2391 = vmatpush2.bf16.msra.mxu1 %v2482_v16  ;;  %v2578_v16 = vld [vmem:[%s2910_s11 + $0x2e0] ss:$8 sps:$4 sm:$0xff]  }
  0x3d   : > { %1259 = vmatprep.subr.bf16.mxu0 %v2776_v1  ;;  %2376 = vmatprep.subr.bf16.mxu1 %v2776_v1 }
  0x40   : > { %1260 = vmatpush2.bf16.msra.mxu0 %v2483_v17  ;;  %2392 = vmatpush2.bf16.msra.mxu1 %v2483_v17  ;;  %v2579_v17 = vld [vmem:[%s2910_s11 + $0xf4] ss:$8 sps:$4 sm:$0xff]  }
  0x41   : > { %1261 = vmatprep.subr.bf16.mxu0 %v2776_v1  ;;  %2377 = vmatprep.subr.bf16.mxu1 %v2776_v1 }
  0x44   : > { %1262 = vmatpush2.bf16.msra.mxu0 %v2484_v18  ;;  %2393 = vmatpush2.bf16.msra.mxu1 %v2484_v18  ;;  %v2581_v18 = vld [vmem:[%s2910_s11 + $0x2f4] ss:$8 sps:$4 sm:$0xff]  }
  0x45   : > { %1263 = vmatprep.subr.bf16.mxu0 %v2776_v1  ;;  %2378 = vmatprep.subr.bf16.mxu1 %v2776_v1 }
  0x48   : > { %1264 = vmatpush2.bf16.msra.mxu0 %v2485_v19  ;;  %2394 = vmatpush2.bf16.msra.mxu1 %v2485_v19  ;;  %v2583_v19 = vld [vmem:[%s2910_s11 + $0xf0] ss:$8 sps:$4 sm:$0xff]  }
  0x49   : > { %1265 = vmatprep.subr.bf16.mxu0 %v2776_v1  ;;  %2379 = vmatprep.subr.bf16.mxu1 %v2776_v1 }
  0x4c   : > { %1266 = vmatpush2.bf16.msra.mxu0 %v2486_v20  ;;  %2395 = vmatpush2.bf16.msra.mxu1 %v2486_v20  ;;  %v2584_v20 = vld [vmem:[%s2910_s11 + $0x2f0] ss:$8 sps:$4 sm:$0xff]  }
  0x4d   : > { %1267 = vmatprep.subr.bf16.mxu0 %v2776_v1  ;;  %2380 = vmatprep.subr.bf16.mxu1 %v2776_v1 }
  0x50   : > { %1268 = vmatpush2.bf16.msra.mxu0 %v2487_v21  ;;  %2396 = vmatpush2.bf16.msra.mxu1 %v2487_v21  ;;  %v2585_v21 = vld [vmem:[%s2910_s11 + $0x104] ss:$8 sps:$4 sm:$0xff]  }
  0x51   : > { %1269 = vmatprep.subr.bf16.mxu0 %v2776_v1  ;;  %2381 = vmatprep.subr.bf16.mxu1 %v2776_v1  ;;  %v2555_v1 = vld [vmem:[%s2910_s11 + $0xb4] ss:$8 sps:$4 sm:$0xff]  }
  0x54   : > { %1270 = vmatpush2.bf16.msra.mxu0 %v2488_v22  ;;  %2397 = vmatpush2.bf16.msra.mxu1 %v2488_v22  ;;  %v2587_v22 = vld [vmem:[%s2910_s11 + $0x304] ss:$8 sps:$4 sm:$0xff]  }
  0x57   : > { %1272 = vmatmul.mubr.bf16.vlgmr.msra.gmra.mxu0 %v2489_v23  ;;  %1528 = vmatmul.mubr.bf16.vlgmr.msra.gmra.mxu1 %v2492_v24  ;;  %v2589_v23 = vld [vmem:[%s2910_s11 + $0x100] ss:$8 sps:$4 sm:$0xff]  }
  0x58   : > { %2297 = vmatprep.mubr.msk.bf16.mxu0 %vm1039_vm1, %v2495_v25  ;;  %2329 = vmatprep.mubr.msk.bf16.mxu1 %vm1039_vm1, %v2497_v26  ;;  %v2590_v24 = vld [vmem:[%s2910_s11 + $0x300] ss:$8 sps:$4 sm:$0xff]   ;;  %v2591_v25 = vld [vmem:[%s2910_s11 + $0x114] ss:$8 sps:$4 sm:$0xff]  }
  0x59   : > { %v2593_v26 = vld [vmem:[%s2910_s11 + $0x314] ss:$8 sps:$4 sm:$0xff]  }
  0x5f   : > { %1280 = vmatmul.mubr.bf16.gmra.mxu0 %v2499_v27  ;;  %1536 = vmatmul.mubr.bf16.gmra.mxu1 %v2500_v28  ;;  %v2595_v27 = vld [vmem:[%s2910_s11 + $0x110] ss:$8 sps:$4 sm:$0xff]  }
  0x60   : > { %2298 = vmatprep.mubr.msk.bf16.mxu0 %vm1039_vm1, %v2501_v29  ;;  %2330 = vmatprep.mubr.msk.bf16.mxu1 %vm1039_vm1, %v2503_v30  ;;  %v2596_v28 = vld [vmem:[%s2910_s11 + $0x310] ss:$8 sps:$4 sm:$0xff]   ;;  %v2597_v29 = vld [vmem:[%s2910_s11 + $0x124] ss:$8 sps:$4 sm:$0xff]  }
  0x61   : > { %v2599_v30 = vld [vmem:[%s2910_s11 + $0x324] ss:$8 sps:$4 sm:$0xff]  }
  0x67   : > { %1288 = vmatmul.mubr.bf16.gmra.mxu0 %v2505_v31  ;;  %1544 = vmatmul.mubr.bf16.gmra.mxu1 %v2506_v32  ;;  %v2601_v31 = vld [vmem:[%s2910_s11 + $0x120] ss:$8 sps:$4 sm:$0xff]  }
  0x68   : > { %2299 = vmatprep.mubr.msk.bf16.mxu0 %vm1039_vm1, %v2507_v33  ;;  %2331 = vmatprep.mubr.msk.bf16.mxu1 %vm1039_vm1, %v2509_v34  ;;  %v2602_v32 = vld [vmem:[%s2910_s11 + $0x320] ss:$8 sps:$4 sm:$0xff]   ;;  %v2603_v33 = vld [vmem:[%s2910_s11 + $0x134] ss:$8 sps:$4 sm:$0xff]  }
  0x69   : > { %v2605_v34 = vld [vmem:[%s2910_s11 + $0x334] ss:$8 sps:$4 sm:$0xff]  }
  0x6f   : > { %1296 = vmatmul.mubr.bf16.gmra.mxu0 %v2511_v35  ;;  %1552 = vmatmul.mubr.bf16.gmra.mxu1 %v2512_v36  ;;  %v2607_v35 = vld [vmem:[%s2910_s11 + $0x130] ss:$8 sps:$4 sm:$0xff]  }
  0x70   : > { %2300 = vmatprep.mubr.msk.bf16.mxu0 %vm1039_vm1, %v2513_v37  ;;  %2332 = vmatprep.mubr.msk.bf16.mxu1 %vm1039_vm1, %v2515_v38  ;;  %v2608_v36 = vld [vmem:[%s2910_s11 + $0x330] ss:$8 sps:$4 sm:$0xff]   ;;  %v2609_v37 = vld [vmem:[%s2910_s11 + $0x144] ss:$8 sps:$4 sm:$0xff]  }
  0x71   : > { %v2611_v38 = vld [vmem:[%s2910_s11 + $0x344] ss:$8 sps:$4 sm:$0xff]  }
  0x77   : > { %1304 = vmatmul.mubr.bf16.gmra.mxu0 %v2517_v39  ;;  %1560 = vmatmul.mubr.bf16.gmra.mxu1 %v2518_v40  ;;  %v2613_v39 = vld [vmem:[%s2910_s11 + $0x140] ss:$8 sps:$4 sm:$0xff]  }
  0x78   : > { %2301 = vmatprep.mubr.msk.bf16.mxu0 %vm1039_vm1, %v2519_v41  ;;  %2333 = vmatprep.mubr.msk.bf16.mxu1 %vm1039_vm1, %v2521_v42  ;;  %v2614_v40 = vld [vmem:[%s2910_s11 + $0x340] ss:$8 sps:$4 sm:$0xff]   ;;  %v2615_v41 = vld [vmem:[%s2910_s11 + $0x154] ss:$8 sps:$4 sm:$0xff]  }
  0x79   : > { %v2617_v42 = vld [vmem:[%s2910_s11 + $0x354] ss:$8 sps:$4 sm:$0xff]  }
  0x7f   : > { %1312 = vmatmul.mubr.bf16.gmra.mxu0 %v2523_v43  ;;  %1568 = vmatmul.mubr.bf16.gmra.mxu1 %v2524_v44  ;;  %v2619_v43 = vld [vmem:[%s2910_s11 + $0x150] ss:$8 sps:$4 sm:$0xff]  }
  0x80   : > { %2302 = vmatprep.mubr.msk.bf16.mxu0 %vm1039_vm1, %v2525_v45  ;;  %2334 = vmatprep.mubr.msk.bf16.mxu1 %vm1039_vm1, %v2527_v46  ;;  %v2620_v44 = vld [vmem:[%s2910_s11 + $0x350] ss:$8 sps:$4 sm:$0xff]   ;;  %v2621_v45 = vld [vmem:[%s2910_s11 + $0x164] ss:$8 sps:$4 sm:$0xff]  }
  0x81   : > { %v2623_v46 = vld [vmem:[%s2910_s11 + $0x364] ss:$8 sps:$4 sm:$0xff]  }
  0x87   : > { %1320 = vmatmul.mubr.bf16.gmra.mxu0 %v2529_v47  ;;  %1576 = vmatmul.mubr.bf16.gmra.mxu1 %v2530_v48  ;;  %v2625_v47 = vld [vmem:[%s2910_s11 + $0x160] ss:$8 sps:$4 sm:$0xff]  }
  0x88   : > { %2303 = vmatprep.mubr.msk.bf16.mxu0 %vm1039_vm1, %v2531_v49  ;;  %2335 = vmatprep.mubr.msk.bf16.mxu1 %vm1039_vm1, %v2533_v50  ;;  %v2626_v48 = vld [vmem:[%s2910_s11 + $0x360] ss:$8 sps:$4 sm:$0xff]   ;;  %v2627_v49 = vld [vmem:[%s2910_s11 + $0x174] ss:$8 sps:$4 sm:$0xff]  }
  0x89   : > { %v2629_v50 = vld [vmem:[%s2910_s11 + $0x374] ss:$8 sps:$4 sm:$0xff]  }
  0x8f   : > { %1328 = vmatmul.mubr.bf16.gmra.mxu0 %v2535_v51  ;;  %1584 = vmatmul.mubr.bf16.gmra.mxu1 %v2536_v52  ;;  %v2631_v51 = vld [vmem:[%s2910_s11 + $0x170] ss:$8 sps:$4 sm:$0xff]  }
  0x90   : > { %2304 = vmatprep.mubr.msk.bf16.mxu0 %vm1039_vm1, %v2537_v53  ;;  %2336 = vmatprep.mubr.msk.bf16.mxu1 %vm1039_vm1, %v2539_v54  ;;  %v2632_v52 = vld [vmem:[%s2910_s11 + $0x370] ss:$8 sps:$4 sm:$0xff]   ;;  %v2633_v53 = vld [vmem:[%s2910_s11 + $0x184] ss:$8 sps:$4 sm:$0xff]  }
  0x91   : > { %v2635_v54 = vld [vmem:[%s2910_s11 + $0x384] ss:$8 sps:$4 sm:$0xff]  }
  0x97   : > { %1336 = vmatmul.mubr.bf16.gmra.mxu0 %v2541_v55  ;;  %1592 = vmatmul.mubr.bf16.gmra.mxu1 %v2542_v56  ;;  %v2637_v55 = vld [vmem:[%s2910_s11 + $0x180] ss:$8 sps:$4 sm:$0xff]  }
  0x98   : > { %2305 = vmatprep.mubr.msk.bf16.mxu0 %vm1039_vm1, %v2543_v57  ;;  %2337 = vmatprep.mubr.msk.bf16.mxu1 %vm1039_vm1, %v2545_v58  ;;  %v2638_v56 = vld [vmem:[%s2910_s11 + $0x380] ss:$8 sps:$4 sm:$0xff]   ;;  %v2639_v57 = vld [vmem:[%s2910_s11 + $0x194] ss:$8 sps:$4 sm:$0xff]  }
  0x99   : > { %v2641_v58 = vld [vmem:[%s2910_s11 + $0x394] ss:$8 sps:$4 sm:$0xff]  }
  0x9f   : > { %1344 = vmatmul.mubr.bf16.gmra.mxu0 %v2547_v59  ;;  %1600 = vmatmul.mubr.bf16.gmra.mxu1 %v2548_v60  ;;  %v3120_v59 = vld [vmem:[%s3492_s2] ss:$0 sm:$0xff] }
  0xa0   : > { %2306 = vmatprep.mubr.msk.bf16.mxu0 %vm1039_vm1, %v2549_v61  ;;  %2338 = vmatprep.mubr.msk.bf16.mxu1 %vm1039_vm1, %v2551_v62 }
  0xa7   : > { %1352 = vmatmul.mubr.bf16.gmra.mxu0 %v2553_v63  ;;  %1608 = vmatmul.mubr.bf16.gmra.mxu1 %v2554_v0 }
  0xa8   : > { %2307 = vmatprep.mubr.msk.bf16.mxu0 %vm1039_vm1, %v2555_v1  ;;  %2339 = vmatprep.mubr.msk.bf16.mxu1 %vm1039_vm1, %v2557_v2 }
  0xaf   : > { %1360 = vmatmul.mubr.bf16.gmra.mxu0 %v2559_v3  ;;  %1616 = vmatmul.mubr.bf16.gmra.mxu1 %v2560_v4 }
  0xb0   : > { %2308 = vmatprep.mubr.msk.bf16.mxu0 %vm1039_vm1, %v2561_v5  ;;  %2340 = vmatprep.mubr.msk.bf16.mxu1 %vm1039_vm1, %v2563_v6  ;;  %v2643_v6 = vld [vmem:[%s2910_s11 + $0x190] ss:$8 sps:$4 sm:$0xff]  }
  0xb7   : > { %1368 = vmatmul.mubr.bf16.gmra.mxu0 %v2565_v7  ;;  %1624 = vmatmul.mubr.bf16.gmra.mxu1 %v2566_v8  ;;  %v2644_v7 = vld [vmem:[%s2910_s11 + $0x390] ss:$8 sps:$4 sm:$0xff]  }
  0xb8   : > { %2309 = vmatprep.mubr.msk.bf16.mxu0 %vm1039_vm1, %v2567_v9  ;;  %2341 = vmatprep.mubr.msk.bf16.mxu1 %vm1039_vm1, %v2569_v10  ;;  %v2645_v10 = vld [vmem:[%s2910_s11 + $0x1a4] ss:$8 sps:$4 sm:$0xff]  }
  0xbf   : > { %1376 = vmatmul.mubr.bf16.gmra.mxu0 %v2571_v11  ;;  %1632 = vmatmul.mubr.bf16.gmra.mxu1 %v2572_v12  ;;  %v2647_v11 = vld [vmem:[%s2910_s11 + $0x3a4] ss:$8 sps:$4 sm:$0xff]  }
  0xc0   : > { %2310 = vmatprep.mubr.msk.bf16.mxu0 %vm1039_vm1, %v2573_v13  ;;  %2342 = vmatprep.mubr.msk.bf16.mxu1 %vm1039_vm1, %v2575_v14 }
  0xc7   : > { %1384 = vmatmul.mubr.bf16.gmra.mxu0 %v2577_v15  ;;  %1640 = vmatmul.mubr.bf16.gmra.mxu1 %v2578_v16 }
  0xc8   : > { %2311 = vmatprep.mubr.msk.bf16.mxu0 %vm1039_vm1, %v2579_v17  ;;  %2343 = vmatprep.mubr.msk.bf16.mxu1 %vm1039_vm1, %v2581_v18 }
  0xcf   : > { %1392 = vmatmul.mubr.bf16.gmra.mxu0 %v2583_v19  ;;  %1648 = vmatmul.mubr.bf16.gmra.mxu1 %v2584_v20 }
  0xd0   : > { %2312 = vmatprep.mubr.msk.bf16.mxu0 %vm1039_vm1, %v2585_v21  ;;  %2344 = vmatprep.mubr.msk.bf16.mxu1 %vm1039_vm1, %v2587_v22 }
  0xd7   : > { %1400 = vmatmul.mubr.bf16.gmra.mxu0 %v2589_v23  ;;  %1656 = vmatmul.mubr.bf16.gmra.mxu1 %v2590_v24 }
  0xd8   : > { %2313 = vmatprep.mubr.msk.bf16.mxu0 %vm1039_vm1, %v2591_v25  ;;  %2345 = vmatprep.mubr.msk.bf16.mxu1 %vm1039_vm1, %v2593_v26  ;;  %v2649_v26 = vld [vmem:[%s2910_s11 + $0x1a0] ss:$8 sps:$4 sm:$0xff]  }
  0xdf   : > { %1408 = vmatmul.mubr.bf16.gmra.mxu0 %v2595_v27  ;;  %1664 = vmatmul.mubr.bf16.gmra.mxu1 %v2596_v28  ;;  %v2650_v27 = vld [vmem:[%s2910_s11 + $0x3a0] ss:$8 sps:$4 sm:$0xff]  }
  0xe0   : > { %2314 = vmatprep.mubr.msk.bf16.mxu0 %vm1039_vm1, %v2597_v29  ;;  %2346 = vmatprep.mubr.msk.bf16.mxu1 %vm1039_vm1, %v2599_v30  ;;  %v2651_v30 = vld [vmem:[%s2910_s11 + $0x1b4] ss:$8 sps:$4 sm:$0xff]  }
  0xe7   : > { %1416 = vmatmul.mubr.bf16.gmra.mxu0 %v2601_v31  ;;  %1672 = vmatmul.mubr.bf16.gmra.mxu1 %v2602_v32  ;;  %v2653_v31 = vld [vmem:[%s2910_s11 + $0x3b4] ss:$8 sps:$4 sm:$0xff]  }
  0xe8   : > { %2315 = vmatprep.mubr.msk.bf16.mxu0 %vm1039_vm1, %v2603_v33  ;;  %2347 = vmatprep.mubr.msk.bf16.mxu1 %vm1039_vm1, %v2605_v34 }
  0xef   : > { %1424 = vmatmul.mubr.bf16.gmra.mxu0 %v2607_v35  ;;  %1680 = vmatmul.mubr.bf16.gmra.mxu1 %v2608_v36 }
  0xf0   : > { %2316 = vmatprep.mubr.msk.bf16.mxu0 %vm1039_vm1, %v2609_v37  ;;  %2348 = vmatprep.mubr.msk.bf16.mxu1 %vm1039_vm1, %v2611_v38 }
  0xf7   : > { %1432 = vmatmul.mubr.bf16.gmra.mxu0 %v2613_v39  ;;  %1688 = vmatmul.mubr.bf16.gmra.mxu1 %v2614_v40 }
  0xf8   : > { %2317 = vmatprep.mubr.msk.bf16.mxu0 %vm1039_vm1, %v2615_v41  ;;  %2349 = vmatprep.mubr.msk.bf16.mxu1 %vm1039_vm1, %v2617_v42 }
  0xff   : > { %1440 = vmatmul.mubr.bf16.gmra.mxu0 %v2619_v43  ;;  %1696 = vmatmul.mubr.bf16.gmra.mxu1 %v2620_v44 }
 0x100   : > { %2318 = vmatprep.mubr.msk.bf16.mxu0 %vm1039_vm1, %v2621_v45  ;;  %2350 = vmatprep.mubr.msk.bf16.mxu1 %vm1039_vm1, %v2623_v46  ;;  %v2655_v46 = vld [vmem:[%s2910_s11 + $0x1b0] ss:$8 sps:$4 sm:$0xff]  }
 0x107   : > { %1448 = vmatmul.mubr.bf16.gmra.mxu0 %v2625_v47  ;;  %1704 = vmatmul.mubr.bf16.gmra.mxu1 %v2626_v48  ;;  %v2656_v47 = vld [vmem:[%s2910_s11 + $0x3b0] ss:$8 sps:$4 sm:$0xff]  }
 0x108   : > { %2319 = vmatprep.mubr.msk.bf16.mxu0 %vm1039_vm1, %v2627_v49  ;;  %2351 = vmatprep.mubr.msk.bf16.mxu1 %vm1039_vm1, %v2629_v50  ;;  %v2657_v50 = vld [vmem:[%s2910_s11 + $0x1c4] ss:$8 sps:$4 sm:$0xff]  }
 0x10f   : > { %1456 = vmatmul.mubr.bf16.gmra.mxu0 %v2631_v51  ;;  %1712 = vmatmul.mubr.bf16.gmra.mxu1 %v2632_v52  ;;  %v2659_v51 = vld [vmem:[%s2910_s11 + $0x3c4] ss:$8 sps:$4 sm:$0xff]  }
 0x110   : > { %2320 = vmatprep.mubr.msk.bf16.mxu0 %vm1039_vm1, %v2633_v53  ;;  %2352 = vmatprep.mubr.msk.bf16.mxu1 %vm1039_vm1, %v2635_v54 }
 0x117   : > { %v1273_v60 = vpop.f32.mrf.mxu0  ;;  %1464 = vmatmul.mubr.bf16.gmra.mxu0 %v2637_v55  ;;  %v1529_v61 = vpop.f32.mrf.mxu1  ;;  %1720 = vmatmul.mubr.bf16.gmra.mxu1 %v2638_v56 }
 0x118   : > { %v1274_v62 = vadd.f32 %v3120_v59, %v1273_v60  ;;  %v1530_v63 = vadd.f32 %v3120_v59, %v1529_v61  ;;  %2321 = vmatprep.mubr.msk.bf16.mxu0 %vm1039_vm1, %v2639_v57  ;;  %2353 = vmatprep.mubr.msk.bf16.mxu1 %vm1039_vm1, %v2641_v58 }
 0x119   : > { %v1275_v0 = vpop.f32.mrf.mxu0  ;;  %v1531_v1 = vpop.f32.mrf.mxu1 }
 0x11a   : > { %v1784_v2 = vmax.f32 %v1274_v62, 0.0  ;;  %v1848_v3 = vmax.f32 %v1530_v63, 0.0 }
 0x11b   : > { %v1276_v4 = vpop.f32.mrf.mxu0  ;;  %v1532_v5 = vpop.f32.mrf.mxu1 }
 0x11c   : > { %1912 = vst [vmem:[%s3130_s8] sm:$0xff] %v1784_v2  ;;  %1976 = vst [vmem:[%s3130_s8 + $0x200] sm:$0xff] %v1848_v3  ;;  %v1277_v8 = vadd.f32 %v3120_v59, %v1276_v4  ;;  %v1533_v9 = vadd.f32 %v3120_v59, %v1532_v5  ;;  %v2661_v3 = vld [vmem:[%s2910_s11 + $0x1c0] ss:$8 sps:$4 sm:$0xff]  }
 0x11d   : > { %v1278_v12 = vpop.f32.mrf.mxu0  ;;  %v1534_v13 = vpop.f32.mrf.mxu1  ;;  %v2662_v4 = vld [vmem:[%s2910_s11 + $0x3c0] ss:$8 sps:$4 sm:$0xff]  }
 0x11e   : > { %v1785_v14 = vmax.f32 %v1277_v8, 0.0  ;;  %v1849_v15 = vmax.f32 %v1533_v9, 0.0  ;;  %v2665_v8 = vld [vmem:[%s2910_s11 + $0x3d4] ss:$8 sps:$4 sm:$0xff]  }
 0x11f   : > { %v1281_v16 = vpop.f32.mrf.mxu0  ;;  %1472 = vmatmul.mubr.bf16.gmra.mxu0 %v2643_v6  ;;  %v1537_v17 = vpop.f32.mrf.mxu1  ;;  %1728 = vmatmul.mubr.bf16.gmra.mxu1 %v2644_v7  ;;  %v2663_v7 = vld [vmem:[%s2910_s11 + $0x1d4] ss:$8 sps:$4 sm:$0xff]  }
 0x120   : > { %1913 = vst [vmem:[%s3130_s8 + $0x8] sm:$0xff] %v1785_v14  ;;  %1977 = vst [vmem:[%s3130_s8 + $0x208] sm:$0xff] %v1849_v15  ;;  %v1282_v18 = vadd.f32 %v3120_v59, %v1281_v16  ;;  %v1538_v19 = vadd.f32 %v3120_v59, %v1537_v17  ;;  %2322 = vmatprep.mubr.msk.bf16.mxu0 %vm1039_vm1, %v2645_v10  ;;  %2354 = vmatprep.mubr.msk.bf16.mxu1 %vm1039_vm1, %v2647_v11 }
 0x121   : > { %v1283_v20 = vpop.f32.mrf.mxu0  ;;  %v1539_v21 = vpop.f32.mrf.mxu1 }
 0x122   : > { %v1786_v22 = vmax.f32 %v1282_v18, 0.0  ;;  %v1850_v23 = vmax.f32 %v1538_v19, 0.0 }
 0x123   : > { %v1284_v24 = vpop.f32.mrf.mxu0  ;;  %v1540_v25 = vpop.f32.mrf.mxu1 }
 0x124   : > { %1914 = vst [vmem:[%s3130_s8 + $0x10] sm:$0xff] %v1786_v22  ;;  %1978 = vst [vmem:[%s3130_s8 + $0x210] sm:$0xff] %v1850_v23  ;;  %v1285_v28 = vadd.f32 %v3120_v59, %v1284_v24  ;;  %v1541_v29 = vadd.f32 %v3120_v59, %v1540_v25  ;;  %v2667_v23 = vld [vmem:[%s2910_s11 + $0x1d0] ss:$8 sps:$4 sm:$0xff]  }
 0x125   : > { %v1286_v32 = vpop.f32.mrf.mxu0  ;;  %v1542_v33 = vpop.f32.mrf.mxu1  ;;  %v2668_v24 = vld [vmem:[%s2910_s11 + $0x3d0] ss:$8 sps:$4 sm:$0xff]  }
 0x126   : > { %v1787_v34 = vmax.f32 %v1285_v28, 0.0  ;;  %v1851_v35 = vmax.f32 %v1541_v29, 0.0  ;;  %v2671_v28 = vld [vmem:[%s2910_s11 + $0x3e4] ss:$8 sps:$4 sm:$0xff]  }
 0x127   : > { %v1289_v36 = vpop.f32.mrf.mxu0  ;;  %1480 = vmatmul.mubr.bf16.gmra.mxu0 %v2649_v26  ;;  %v1545_v37 = vpop.f32.mrf.mxu1  ;;  %1736 = vmatmul.mubr.bf16.gmra.mxu1 %v2650_v27  ;;  %v2669_v27 = vld [vmem:[%s2910_s11 + $0x1e4] ss:$8 sps:$4 sm:$0xff]  }
 0x128   : > { %1915 = vst [vmem:[%s3130_s8 + $0x18] sm:$0xff] %v1787_v34  ;;  %1979 = vst [vmem:[%s3130_s8 + $0x218] sm:$0xff] %v1851_v35  ;;  %v1290_v38 = vadd.f32 %v3120_v59, %v1289_v36  ;;  %v1546_v39 = vadd.f32 %v3120_v59, %v1545_v37  ;;  %2323 = vmatprep.mubr.msk.bf16.mxu0 %vm1039_vm1, %v2651_v30  ;;  %2355 = vmatprep.mubr.msk.bf16.mxu1 %vm1039_vm1, %v2653_v31 }
 0x129   : > { %v1291_v40 = vpop.f32.mrf.mxu0  ;;  %v1547_v41 = vpop.f32.mrf.mxu1 }
 0x12a   : > { %v1788_v42 = vmax.f32 %v1290_v38, 0.0  ;;  %v1852_v43 = vmax.f32 %v1546_v39, 0.0 }
 0x12b   : > { %v1292_v44 = vpop.f32.mrf.mxu0  ;;  %v1548_v45 = vpop.f32.mrf.mxu1 }
 0x12c   : > { %1916 = vst [vmem:[%s3130_s8 + $0x20] sm:$0xff] %v1788_v42  ;;  %1980 = vst [vmem:[%s3130_s8 + $0x220] sm:$0xff] %v1852_v43  ;;  %v1293_v48 = vadd.f32 %v3120_v59, %v1292_v44  ;;  %v1549_v49 = vadd.f32 %v3120_v59, %v1548_v45  ;;  %v2673_v43 = vld [vmem:[%s2910_s11 + $0x1e0] ss:$8 sps:$4 sm:$0xff]  }
 0x12d   : > { %v1294_v52 = vpop.f32.mrf.mxu0  ;;  %v1550_v53 = vpop.f32.mrf.mxu1  ;;  %v2674_v44 = vld [vmem:[%s2910_s11 + $0x3e0] ss:$8 sps:$4 sm:$0xff]  }
 0x12e   : > { %v1789_v54 = vmax.f32 %v1293_v48, 0.0  ;;  %v1853_v55 = vmax.f32 %v1549_v49, 0.0  ;;  %v2677_v48 = vld [vmem:[%s2910_s11 + $0x3f4] ss:$8 sps:$4 sm:$0xff]  }
 0x12f   : > { %v1297_v56 = vpop.f32.mrf.mxu0  ;;  %1488 = vmatmul.mubr.bf16.gmra.mxu0 %v2655_v46  ;;  %v1553_v57 = vpop.f32.mrf.mxu1  ;;  %1744 = vmatmul.mubr.bf16.gmra.mxu1 %v2656_v47  ;;  %v2675_v47 = vld [vmem:[%s2910_s11 + $0x1f4] ss:$8 sps:$4 sm:$0xff]  }
 0x130   : > { %1917 = vst [vmem:[%s3130_s8 + $0x28] sm:$0xff] %v1789_v54  ;;  %1981 = vst [vmem:[%s3130_s8 + $0x228] sm:$0xff] %v1853_v55  ;;  %v1298_v58 = vadd.f32 %v3120_v59, %v1297_v56  ;;  %v1554_v60 = vadd.f32 %v3120_v59, %v1553_v57  ;;  %2324 = vmatprep.mubr.msk.bf16.mxu0 %vm1039_vm1, %v2657_v50  ;;  %2356 = vmatprep.mubr.msk.bf16.mxu1 %vm1039_vm1, %v2659_v51 }
 0x131   : > { %v1299_v61 = vpop.f32.mrf.mxu0  ;;  %v1555_v62 = vpop.f32.mrf.mxu1 }
 0x132   : > { %v1790_v63 = vmax.f32 %v1298_v58, 0.0  ;;  %v1854_v0 = vmax.f32 %v1554_v60, 0.0 }
 0x133   : > { %v1300_v1 = vpop.f32.mrf.mxu0  ;;  %v1556_v2 = vpop.f32.mrf.mxu1 }
 0x134   : > { %1918 = vst [vmem:[%s3130_s8 + $0x30] sm:$0xff] %v1790_v63  ;;  %1982 = vst [vmem:[%s3130_s8 + $0x230] sm:$0xff] %v1854_v0  ;;  %v1301_v5 = vadd.f32 %v3120_v59, %v1300_v1  ;;  %v1557_v6 = vadd.f32 %v3120_v59, %v1556_v2  ;;  %v2679_v0 = vld [vmem:[%s2910_s11 + $0x1f0] ss:$8 sps:$4 sm:$0xff]  }
 0x135   : > { %v1302_v9 = vpop.f32.mrf.mxu0  ;;  %v1558_v10 = vpop.f32.mrf.mxu1  ;;  %v2680_v1 = vld [vmem:[%s2910_s11 + $0x3f0] ss:$8 sps:$4 sm:$0xff]  }
 0x136   : > { %v1791_v11 = vmax.f32 %v1301_v5, 0.0  ;;  %v1855_v12 = vmax.f32 %v1557_v6, 0.0 }
 0x137   : > { %v1305_v13 = vpop.f32.mrf.mxu0  ;;  %1496 = vmatmul.mubr.bf16.gmra.mxu0 %v2661_v3  ;;  %v1561_v14 = vpop.f32.mrf.mxu1  ;;  %1752 = vmatmul.mubr.bf16.gmra.mxu1 %v2662_v4 }
 0x138   : > { %1919 = vst [vmem:[%s3130_s8 + $0x38] sm:$0xff] %v1791_v11  ;;  %1983 = vst [vmem:[%s3130_s8 + $0x238] sm:$0xff] %v1855_v12  ;;  %v1306_v15 = vadd.f32 %v3120_v59, %v1305_v13  ;;  %v1562_v16 = vadd.f32 %v3120_v59, %v1561_v14  ;;  %2325 = vmatprep.mubr.msk.bf16.mxu0 %vm1039_vm1, %v2663_v7  ;;  %2357 = vmatprep.mubr.msk.bf16.mxu1 %vm1039_vm1, %v2665_v8 }
 0x139   : > { %v1307_v17 = vpop.f32.mrf.mxu0  ;;  %v1563_v18 = vpop.f32.mrf.mxu1 }
 0x13a   : > { %v1792_v19 = vmax.f32 %v1306_v15, 0.0  ;;  %v1856_v20 = vmax.f32 %v1562_v16, 0.0 }
 0x13b   : > { %v1308_v21 = vpop.f32.mrf.mxu0  ;;  %v1564_v22 = vpop.f32.mrf.mxu1 }
 0x13c   : > { %1920 = vst [vmem:[%s3130_s8 + $0x40] sm:$0xff] %v1792_v19  ;;  %1984 = vst [vmem:[%s3130_s8 + $0x240] sm:$0xff] %v1856_v20  ;;  %v1309_v25 = vadd.f32 %v3120_v59, %v1308_v21  ;;  %v1565_v26 = vadd.f32 %v3120_v59, %v1564_v22 }
 0x13d   : > { %v1310_v29 = vpop.f32.mrf.mxu0  ;;  %v1566_v30 = vpop.f32.mrf.mxu1 }
 0x13e   : > { %v1793_v31 = vmax.f32 %v1309_v25, 0.0  ;;  %v1857_v32 = vmax.f32 %v1565_v26, 0.0 }
 0x13f   : > { %v1313_v33 = vpop.f32.mrf.mxu0  ;;  %1504 = vmatmul.mubr.bf16.gmra.mxu0 %v2667_v23  ;;  %v1569_v34 = vpop.f32.mrf.mxu1  ;;  %1760 = vmatmul.mubr.bf16.gmra.mxu1 %v2668_v24 }
 0x140   : > { %1921 = vst [vmem:[%s3130_s8 + $0x48] sm:$0xff] %v1793_v31  ;;  %1985 = vst [vmem:[%s3130_s8 + $0x248] sm:$0xff] %v1857_v32  ;;  %v1314_v35 = vadd.f32 %v3120_v59, %v1313_v33  ;;  %v1570_v36 = vadd.f32 %v3120_v59, %v1569_v34  ;;  %2326 = vmatprep.mubr.msk.bf16.mxu0 %vm1039_vm1, %v2669_v27  ;;  %2358 = vmatprep.mubr.msk.bf16.mxu1 %vm1039_vm1, %v2671_v28 }
 0x141   : > { %v1315_v37 = vpop.f32.mrf.mxu0  ;;  %v1571_v38 = vpop.f32.mrf.mxu1 }
 0x142   : > { %v1794_v39 = vmax.f32 %v1314_v35, 0.0  ;;  %v1858_v40 = vmax.f32 %v1570_v36, 0.0 }
 0x143   : > { %v1316_v41 = vpop.f32.mrf.mxu0  ;;  %v1572_v42 = vpop.f32.mrf.mxu1 }
 0x144   : > { %1922 = vst [vmem:[%s3130_s8 + $0x50] sm:$0xff] %v1794_v39  ;;  %1986 = vst [vmem:[%s3130_s8 + $0x250] sm:$0xff] %v1858_v40  ;;  %v1317_v45 = vadd.f32 %v3120_v59, %v1316_v41  ;;  %v1573_v46 = vadd.f32 %v3120_v59, %v1572_v42 }
 0x145   : > { %v1318_v49 = vpop.f32.mrf.mxu0  ;;  %v1574_v50 = vpop.f32.mrf.mxu1 }
 0x146   : > { %v1795_v51 = vmax.f32 %v1317_v45, 0.0  ;;  %v1859_v52 = vmax.f32 %v1573_v46, 0.0 }
 0x147   : > { %v1321_v53 = vpop.f32.mrf.mxu0  ;;  %1512 = vmatmul.mubr.bf16.gmra.mxu0 %v2673_v43  ;;  %v1577_v54 = vpop.f32.mrf.mxu1  ;;  %1768 = vmatmul.mubr.bf16.gmra.mxu1 %v2674_v44 }
 0x148   : > { %1923 = vst [vmem:[%s3130_s8 + $0x58] sm:$0xff] %v1795_v51  ;;  %1987 = vst [vmem:[%s3130_s8 + $0x258] sm:$0xff] %v1859_v52  ;;  %v1322_v55 = vadd.f32 %v3120_v59, %v1321_v53  ;;  %v1578_v56 = vadd.f32 %v3120_v59, %v1577_v54  ;;  %2327 = vmatprep.mubr.msk.bf16.mxu0 %vm1039_vm1, %v2675_v47  ;;  %2359 = vmatprep.mubr.msk.bf16.mxu1 %vm1039_vm1, %v2677_v48 }
 0x149   : > { %v1323_v57 = vpop.f32.mrf.mxu0  ;;  %v1579_v58 = vpop.f32.mrf.mxu1 }
 0x14a   : > { %v1796_v60 = vmax.f32 %v1322_v55, 0.0  ;;  %v1860_v61 = vmax.f32 %v1578_v56, 0.0 }
 0x14b   : > { %v1324_v62 = vpop.f32.mrf.mxu0  ;;  %v1580_v63 = vpop.f32.mrf.mxu1 }
 0x14c   : > { %1924 = vst [vmem:[%s3130_s8 + $0x60] sm:$0xff] %v1796_v60  ;;  %1988 = vst [vmem:[%s3130_s8 + $0x260] sm:$0xff] %v1860_v61  ;;  %v1325_v2 = vadd.f32 %v3120_v59, %v1324_v62  ;;  %v1581_v3 = vadd.f32 %v3120_v59, %v1580_v63 }
 0x14d   : > { %v1326_v4 = vpop.f32.mrf.mxu0  ;;  %v1582_v5 = vpop.f32.mrf.mxu1 }
 0x14e   : > { %v1797_v6 = vmax.f32 %v1325_v2, 0.0  ;;  %v1861_v7 = vmax.f32 %v1581_v3, 0.0 }
 0x14f   : > { %v1329_v8 = vpop.f32.mrf.mxu0  ;;  %1520 = vmatmul.mubr.bf16.gmra.mxu0 %v2679_v0  ;;  %v1585_v9 = vpop.f32.mrf.mxu1  ;;  %1776 = vmatmul.mubr.bf16.gmra.mxu1 %v2680_v1 }
 0x150   : > { %1925 = vst [vmem:[%s3130_s8 + $0x68] sm:$0xff] %v1797_v6  ;;  %1989 = vst [vmem:[%s3130_s8 + $0x268] sm:$0xff] %v1861_v7  ;;  %v1330_v10 = vadd.f32 %v3120_v59, %v1329_v8  ;;  %v1586_v11 = vadd.f32 %v3120_v59, %v1585_v9 }
 0x151   : > { %v1331_v12 = vpop.f32.mrf.mxu0  ;;  %v1587_v13 = vpop.f32.mrf.mxu1 }
 0x152   : > { %v1798_v14 = vmax.f32 %v1330_v10, 0.0  ;;  %v1862_v15 = vmax.f32 %v1586_v11, 0.0 }
 0x153   : > { %v1332_v16 = vpop.f32.mrf.mxu0  ;;  %v1588_v17 = vpop.f32.mrf.mxu1 }
 0x154   : > { %1926 = vst [vmem:[%s3130_s8 + $0x70] sm:$0xff] %v1798_v14  ;;  %1990 = vst [vmem:[%s3130_s8 + $0x270] sm:$0xff] %v1862_v15  ;;  %v1333_v18 = vadd.f32 %v3120_v59, %v1332_v16  ;;  %v1589_v19 = vadd.f32 %v3120_v59, %v1588_v17 }
 0x155   : > { %v1334_v20 = vpop.f32.mrf.mxu0  ;;  %v1590_v21 = vpop.f32.mrf.mxu1 }
 0x156   : > { %v1799_v22 = vmax.f32 %v1333_v18, 0.0  ;;  %v1863_v23 = vmax.f32 %v1589_v19, 0.0 }
 0x157   : > { %v1337_v24 = vpop.f32.mrf.mxu0  ;;  %v1593_v25 = vpop.f32.mrf.mxu1 }
 0x158   : > { %1927 = vst [vmem:[%s3130_s8 + $0x78] sm:$0xff] %v1799_v22  ;;  %1991 = vst [vmem:[%s3130_s8 + $0x278] sm:$0xff] %v1863_v23  ;;  %v1338_v26 = vadd.f32 %v3120_v59, %v1337_v24  ;;  %v1594_v27 = vadd.f32 %v3120_v59, %v1593_v25 }
 0x159   : > { %v1339_v28 = vpop.f32.mrf.mxu0  ;;  %v1595_v29 = vpop.f32.mrf.mxu1 }
 0x15a   : > { %v1800_v30 = vmax.f32 %v1338_v26, 0.0  ;;  %v1864_v31 = vmax.f32 %v1594_v27, 0.0 }
 0x15b   : > { %v1340_v32 = vpop.f32.mrf.mxu0  ;;  %v1596_v33 = vpop.f32.mrf.mxu1 }
 0x15c   : > { %1928 = vst [vmem:[%s3130_s8 + $0x80] sm:$0xff] %v1800_v30  ;;  %1992 = vst [vmem:[%s3130_s8 + $0x280] sm:$0xff] %v1864_v31  ;;  %v1341_v34 = vadd.f32 %v3120_v59, %v1340_v32  ;;  %v1597_v35 = vadd.f32 %v3120_v59, %v1596_v33 }
 0x15d   : > { %v1342_v36 = vpop.f32.mrf.mxu0  ;;  %v1598_v37 = vpop.f32.mrf.mxu1 }
 0x15e   : > { %v1801_v38 = vmax.f32 %v1341_v34, 0.0  ;;  %v1865_v39 = vmax.f32 %v1597_v35, 0.0 }
 0x15f   : > { %v1345_v40 = vpop.f32.mrf.mxu0  ;;  %v1601_v41 = vpop.f32.mrf.mxu1 }
 0x160   : > { %1929 = vst [vmem:[%s3130_s8 + $0x88] sm:$0xff] %v1801_v38  ;;  %1993 = vst [vmem:[%s3130_s8 + $0x288] sm:$0xff] %v1865_v39  ;;  %v1346_v42 = vadd.f32 %v3120_v59, %v1345_v40  ;;  %v1602_v43 = vadd.f32 %v3120_v59, %v1601_v41 }
 0x161   : > { %v1347_v44 = vpop.f32.mrf.mxu0  ;;  %v1603_v45 = vpop.f32.mrf.mxu1 }
 0x162   : > { %v1802_v46 = vmax.f32 %v1346_v42, 0.0  ;;  %v1866_v47 = vmax.f32 %v1602_v43, 0.0 }
 0x163   : > { %v1348_v48 = vpop.f32.mrf.mxu0  ;;  %v1604_v49 = vpop.f32.mrf.mxu1 }
 0x164   : > { %1930 = vst [vmem:[%s3130_s8 + $0x90] sm:$0xff] %v1802_v46  ;;  %1994 = vst [vmem:[%s3130_s8 + $0x290] sm:$0xff] %v1866_v47  ;;  %v1349_v50 = vadd.f32 %v3120_v59, %v1348_v48  ;;  %v1605_v51 = vadd.f32 %v3120_v59, %v1604_v49 }
 0x165   : > { %v1350_v52 = vpop.f32.mrf.mxu0  ;;  %v1606_v53 = vpop.f32.mrf.mxu1 }
 0x166   : > { %v1803_v54 = vmax.f32 %v1349_v50, 0.0  ;;  %v1867_v55 = vmax.f32 %v1605_v51, 0.0 }
 0x167   : > { %v1353_v56 = vpop.f32.mrf.mxu0  ;;  %v1609_v57 = vpop.f32.mrf.mxu1 }
 0x168   : > { %1931 = vst [vmem:[%s3130_s8 + $0x98] sm:$0xff] %v1803_v54  ;;  %1995 = vst [vmem:[%s3130_s8 + $0x298] sm:$0xff] %v1867_v55  ;;  %v1354_v58 = vadd.f32 %v3120_v59, %v1353_v56  ;;  %v1610_v60 = vadd.f32 %v3120_v59, %v1609_v57 }
 0x169   : > { %v1355_v61 = vpop.f32.mrf.mxu0  ;;  %v1611_v62 = vpop.f32.mrf.mxu1 }
 0x16a   : > { %v1804_v63 = vmax.f32 %v1354_v58, 0.0  ;;  %v1868_v0 = vmax.f32 %v1610_v60, 0.0 }
 0x16b   : > { %v1356_v1 = vpop.f32.mrf.mxu0  ;;  %v1612_v2 = vpop.f32.mrf.mxu1 }
 0x16c   : > { %1932 = vst [vmem:[%s3130_s8 + $0xa0] sm:$0xff] %v1804_v63  ;;  %1996 = vst [vmem:[%s3130_s8 + $0x2a0] sm:$0xff] %v1868_v0  ;;  %v1357_v3 = vadd.f32 %v3120_v59, %v1356_v1  ;;  %v1613_v4 = vadd.f32 %v3120_v59, %v1612_v2 }
 0x16d   : > { %v1358_v5 = vpop.f32.mrf.mxu0  ;;  %v1614_v6 = vpop.f32.mrf.mxu1 }
 0x16e   : > { %v1805_v7 = vmax.f32 %v1357_v3, 0.0  ;;  %v1869_v8 = vmax.f32 %v1613_v4, 0.0 }
 0x16f   : > { %v1361_v9 = vpop.f32.mrf.mxu0  ;;  %v1617_v10 = vpop.f32.mrf.mxu1 }
 0x170   : > { %1933 = vst [vmem:[%s3130_s8 + $0xa8] sm:$0xff] %v1805_v7  ;;  %1997 = vst [vmem:[%s3130_s8 + $0x2a8] sm:$0xff] %v1869_v8  ;;  %v1362_v11 = vadd.f32 %v3120_v59, %v1361_v9  ;;  %v1618_v12 = vadd.f32 %v3120_v59, %v1617_v10 }
 0x171   : > { %v1363_v13 = vpop.f32.mrf.mxu0  ;;  %v1619_v14 = vpop.f32.mrf.mxu1 }
 0x172   : > { %v1806_v15 = vmax.f32 %v1362_v11, 0.0  ;;  %v1870_v16 = vmax.f32 %v1618_v12, 0.0 }
 0x173   : > { %v1364_v17 = vpop.f32.mrf.mxu0  ;;  %v1620_v18 = vpop.f32.mrf.mxu1 }
 0x174   : > { %1934 = vst [vmem:[%s3130_s8 + $0xb0] sm:$0xff] %v1806_v15  ;;  %1998 = vst [vmem:[%s3130_s8 + $0x2b0] sm:$0xff] %v1870_v16  ;;  %v1365_v19 = vadd.f32 %v3120_v59, %v1364_v17  ;;  %v1621_v20 = vadd.f32 %v3120_v59, %v1620_v18 }
 0x175   : > { %v1366_v21 = vpop.f32.mrf.mxu0  ;;  %v1622_v22 = vpop.f32.mrf.mxu1 }
 0x176   : > { %v1807_v23 = vmax.f32 %v1365_v19, 0.0  ;;  %v1871_v24 = vmax.f32 %v1621_v20, 0.0 }
 0x177   : > { %v1369_v25 = vpop.f32.mrf.mxu0  ;;  %v1625_v26 = vpop.f32.mrf.mxu1 }
 0x178   : > { %1935 = vst [vmem:[%s3130_s8 + $0xb8] sm:$0xff] %v1807_v23  ;;  %1999 = vst [vmem:[%s3130_s8 + $0x2b8] sm:$0xff] %v1871_v24  ;;  %v1370_v27 = vadd.f32 %v3120_v59, %v1369_v25  ;;  %v1626_v28 = vadd.f32 %v3120_v59, %v1625_v26 }
 0x179   : > { %v1371_v29 = vpop.f32.mrf.mxu0  ;;  %v1627_v30 = vpop.f32.mrf.mxu1 }
 0x17a   : > { %v1808_v31 = vmax.f32 %v1370_v27, 0.0  ;;  %v1872_v32 = vmax.f32 %v1626_v28, 0.0 }
 0x17b   : > { %v1372_v33 = vpop.f32.mrf.mxu0  ;;  %v1628_v34 = vpop.f32.mrf.mxu1 }
 0x17c   : > { %1936 = vst [vmem:[%s3130_s8 + $0xc0] sm:$0xff] %v1808_v31  ;;  %2000 = vst [vmem:[%s3130_s8 + $0x2c0] sm:$0xff] %v1872_v32  ;;  %v1373_v35 = vadd.f32 %v3120_v59, %v1372_v33  ;;  %v1629_v36 = vadd.f32 %v3120_v59, %v1628_v34 }
 0x17d   : > { %v1374_v37 = vpop.f32.mrf.mxu0  ;;  %v1630_v38 = vpop.f32.mrf.mxu1 }
 0x17e   : > { %v1809_v39 = vmax.f32 %v1373_v35, 0.0  ;;  %v1873_v40 = vmax.f32 %v1629_v36, 0.0 }
 0x17f   : > { %v1377_v41 = vpop.f32.mrf.mxu0  ;;  %v1633_v42 = vpop.f32.mrf.mxu1 }
 0x180   : > { %1937 = vst [vmem:[%s3130_s8 + $0xc8] sm:$0xff] %v1809_v39  ;;  %2001 = vst [vmem:[%s3130_s8 + $0x2c8] sm:$0xff] %v1873_v40  ;;  %v1378_v43 = vadd.f32 %v3120_v59, %v1377_v41  ;;  %v1634_v44 = vadd.f32 %v3120_v59, %v1633_v42 }
 0x181   : > { %v1379_v45 = vpop.f32.mrf.mxu0  ;;  %v1635_v46 = vpop.f32.mrf.mxu1 }
 0x182   : > { %v1810_v47 = vmax.f32 %v1378_v43, 0.0  ;;  %v1874_v48 = vmax.f32 %v1634_v44, 0.0 }
 0x183   : > { %v1380_v49 = vpop.f32.mrf.mxu0  ;;  %v1636_v50 = vpop.f32.mrf.mxu1 }
 0x184   : > { %1938 = vst [vmem:[%s3130_s8 + $0xd0] sm:$0xff] %v1810_v47  ;;  %2002 = vst [vmem:[%s3130_s8 + $0x2d0] sm:$0xff] %v1874_v48  ;;  %v1381_v51 = vadd.f32 %v3120_v59, %v1380_v49  ;;  %v1637_v52 = vadd.f32 %v3120_v59, %v1636_v50 }
 0x185   : > { %v1382_v53 = vpop.f32.mrf.mxu0  ;;  %v1638_v54 = vpop.f32.mrf.mxu1 }
 0x186   : > { %v1811_v55 = vmax.f32 %v1381_v51, 0.0  ;;  %v1875_v56 = vmax.f32 %v1637_v52, 0.0 }
 0x187   : > { %v1385_v57 = vpop.f32.mrf.mxu0  ;;  %v1641_v58 = vpop.f32.mrf.mxu1 }
 0x188   : > { %1939 = vst [vmem:[%s3130_s8 + $0xd8] sm:$0xff] %v1811_v55  ;;  %2003 = vst [vmem:[%s3130_s8 + $0x2d8] sm:$0xff] %v1875_v56  ;;  %v1386_v60 = vadd.f32 %v3120_v59, %v1385_v57  ;;  %v1642_v61 = vadd.f32 %v3120_v59, %v1641_v58 }
 0x189   : > { %v1387_v62 = vpop.f32.mrf.mxu0  ;;  %v1643_v63 = vpop.f32.mrf.mxu1 }
 0x18a   : > { %v1812_v0 = vmax.f32 %v1386_v60, 0.0  ;;  %v1876_v1 = vmax.f32 %v1642_v61, 0.0 }
 0x18b   : > { %v1388_v2 = vpop.f32.mrf.mxu0  ;;  %v1644_v3 = vpop.f32.mrf.mxu1 }
 0x18c   : > { %1940 = vst [vmem:[%s3130_s8 + $0xe0] sm:$0xff] %v1812_v0  ;;  %2004 = vst [vmem:[%s3130_s8 + $0x2e0] sm:$0xff] %v1876_v1  ;;  %v1389_v4 = vadd.f32 %v3120_v59, %v1388_v2  ;;  %v1645_v5 = vadd.f32 %v3120_v59, %v1644_v3 }
 0x18d   : > { %v1390_v6 = vpop.f32.mrf.mxu0  ;;  %v1646_v7 = vpop.f32.mrf.mxu1 }
 0x18e   : > { %v1813_v8 = vmax.f32 %v1389_v4, 0.0  ;;  %v1877_v9 = vmax.f32 %v1645_v5, 0.0 }
 0x18f   : > { %v1393_v10 = vpop.f32.mrf.mxu0  ;;  %v1649_v11 = vpop.f32.mrf.mxu1 }
 0x190   : > { %1941 = vst [vmem:[%s3130_s8 + $0xe8] sm:$0xff] %v1813_v8  ;;  %2005 = vst [vmem:[%s3130_s8 + $0x2e8] sm:$0xff] %v1877_v9  ;;  %v1394_v12 = vadd.f32 %v3120_v59, %v1393_v10  ;;  %v1650_v13 = vadd.f32 %v3120_v59, %v1649_v11 }
 0x191   : > { %v1395_v14 = vpop.f32.mrf.mxu0  ;;  %v1651_v15 = vpop.f32.mrf.mxu1 }
 0x192   : > { %v1814_v16 = vmax.f32 %v1394_v12, 0.0  ;;  %v1878_v17 = vmax.f32 %v1650_v13, 0.0 }
 0x193   : > { %v1396_v18 = vpop.f32.mrf.mxu0  ;;  %v1652_v19 = vpop.f32.mrf.mxu1 }
 0x194   : > { %1942 = vst [vmem:[%s3130_s8 + $0xf0] sm:$0xff] %v1814_v16  ;;  %2006 = vst [vmem:[%s3130_s8 + $0x2f0] sm:$0xff] %v1878_v17  ;;  %v1397_v20 = vadd.f32 %v3120_v59, %v1396_v18  ;;  %v1653_v21 = vadd.f32 %v3120_v59, %v1652_v19 }
 0x195   : > { %v1398_v22 = vpop.f32.mrf.mxu0  ;;  %v1654_v23 = vpop.f32.mrf.mxu1 }
 0x196   : > { %v1815_v24 = vmax.f32 %v1397_v20, 0.0  ;;  %v1879_v25 = vmax.f32 %v1653_v21, 0.0 }
 0x197   : > { %v1401_v26 = vpop.f32.mrf.mxu0  ;;  %v1657_v27 = vpop.f32.mrf.mxu1 }
 0x198   : > { %1943 = vst [vmem:[%s3130_s8 + $0xf8] sm:$0xff] %v1815_v24  ;;  %2007 = vst [vmem:[%s3130_s8 + $0x2f8] sm:$0xff] %v1879_v25  ;;  %v1402_v28 = vadd.f32 %v3120_v59, %v1401_v26  ;;  %v1658_v29 = vadd.f32 %v3120_v59, %v1657_v27 }
 0x199   : > { %v1403_v30 = vpop.f32.mrf.mxu0  ;;  %v1659_v31 = vpop.f32.mrf.mxu1 }
 0x19a   : > { %v1816_v32 = vmax.f32 %v1402_v28, 0.0  ;;  %v1880_v33 = vmax.f32 %v1658_v29, 0.0 }
 0x19b   : > { %v1404_v34 = vpop.f32.mrf.mxu0  ;;  %v1660_v35 = vpop.f32.mrf.mxu1 }
 0x19c   : > { %1944 = vst [vmem:[%s3130_s8 + $0x100] sm:$0xff] %v1816_v32  ;;  %2008 = vst [vmem:[%s3130_s8 + $0x300] sm:$0xff] %v1880_v33  ;;  %v1405_v36 = vadd.f32 %v3120_v59, %v1404_v34  ;;  %v1661_v37 = vadd.f32 %v3120_v59, %v1660_v35 }
 0x19d   : > { %v1406_v38 = vpop.f32.mrf.mxu0  ;;  %v1662_v39 = vpop.f32.mrf.mxu1 }
 0x19e   : > { %v1817_v40 = vmax.f32 %v1405_v36, 0.0  ;;  %v1881_v41 = vmax.f32 %v1661_v37, 0.0 }
 0x19f   : > { %v1409_v42 = vpop.f32.mrf.mxu0  ;;  %v1665_v43 = vpop.f32.mrf.mxu1 }
 0x1a0   : > { %1945 = vst [vmem:[%s3130_s8 + $0x108] sm:$0xff] %v1817_v40  ;;  %2009 = vst [vmem:[%s3130_s8 + $0x308] sm:$0xff] %v1881_v41  ;;  %v1410_v44 = vadd.f32 %v3120_v59, %v1409_v42  ;;  %v1666_v45 = vadd.f32 %v3120_v59, %v1665_v43 }
 0x1a1   : > { %v1411_v46 = vpop.f32.mrf.mxu0  ;;  %v1667_v47 = vpop.f32.mrf.mxu1 }
 0x1a2   : > { %v1818_v48 = vmax.f32 %v1410_v44, 0.0  ;;  %v1882_v49 = vmax.f32 %v1666_v45, 0.0 }
 0x1a3   : > { %v1412_v50 = vpop.f32.mrf.mxu0  ;;  %v1668_v51 = vpop.f32.mrf.mxu1 }
 0x1a4   : > { %1946 = vst [vmem:[%s3130_s8 + $0x110] sm:$0xff] %v1818_v48  ;;  %2010 = vst [vmem:[%s3130_s8 + $0x310] sm:$0xff] %v1882_v49  ;;  %v1413_v52 = vadd.f32 %v3120_v59, %v1412_v50  ;;  %v1669_v53 = vadd.f32 %v3120_v59, %v1668_v51 }
 0x1a5   : > { %v1414_v54 = vpop.f32.mrf.mxu0  ;;  %v1670_v55 = vpop.f32.mrf.mxu1 }
 0x1a6   : > { %v1819_v56 = vmax.f32 %v1413_v52, 0.0  ;;  %v1883_v57 = vmax.f32 %v1669_v53, 0.0 }
 0x1a7   : > { %v1417_v58 = vpop.f32.mrf.mxu0  ;;  %v1673_v60 = vpop.f32.mrf.mxu1 }
 0x1a8   : > { %1947 = vst [vmem:[%s3130_s8 + $0x118] sm:$0xff] %v1819_v56  ;;  %2011 = vst [vmem:[%s3130_s8 + $0x318] sm:$0xff] %v1883_v57  ;;  %v1418_v61 = vadd.f32 %v3120_v59, %v1417_v58  ;;  %v1674_v62 = vadd.f32 %v3120_v59, %v1673_v60 }
 0x1a9   : > { %v1419_v63 = vpop.f32.mrf.mxu0  ;;  %v1675_v0 = vpop.f32.mrf.mxu1 }
 0x1aa   : > { %v1820_v1 = vmax.f32 %v1418_v61, 0.0  ;;  %v1884_v2 = vmax.f32 %v1674_v62, 0.0 }
 0x1ab   : > { %v1420_v3 = vpop.f32.mrf.mxu0  ;;  %v1676_v4 = vpop.f32.mrf.mxu1 }
 0x1ac   : > { %1948 = vst [vmem:[%s3130_s8 + $0x120] sm:$0xff] %v1820_v1  ;;  %2012 = vst [vmem:[%s3130_s8 + $0x320] sm:$0xff] %v1884_v2  ;;  %v1421_v5 = vadd.f32 %v3120_v59, %v1420_v3  ;;  %v1677_v6 = vadd.f32 %v3120_v59, %v1676_v4 }
 0x1ad   : > { %v1422_v7 = vpop.f32.mrf.mxu0  ;;  %v1678_v8 = vpop.f32.mrf.mxu1 }
 0x1ae   : > { %v1821_v9 = vmax.f32 %v1421_v5, 0.0  ;;  %v1885_v10 = vmax.f32 %v1677_v6, 0.0  ;;  %v3350_v7 = vld [vmem:[%s3492_s2] ss:$0 sm:$0xff] }
 0x1af   : > { %v1425_v11 = vpop.f32.mrf.mxu0  ;;  %v1681_v12 = vpop.f32.mrf.mxu1 }
 0x1b0   : > { %1949 = vst [vmem:[%s3130_s8 + $0x128] sm:$0xff] %v1821_v9  ;;  %2013 = vst [vmem:[%s3130_s8 + $0x328] sm:$0xff] %v1885_v10  ;;  %v1426_v13 = vadd.f32 %v3120_v59, %v1425_v11  ;;  %v1682_v14 = vadd.f32 %v3120_v59, %v1681_v12 }
 0x1b1   : > { %v1427_v15 = vpop.f32.mrf.mxu0  ;;  %v1683_v16 = vpop.f32.mrf.mxu1 }
 0x1b2   : > { %v1822_v17 = vmax.f32 %v1426_v13, 0.0  ;;  %v1886_v18 = vmax.f32 %v1682_v14, 0.0 }
 0x1b3   : > { %v1428_v19 = vpop.f32.mrf.mxu0  ;;  %v1684_v20 = vpop.f32.mrf.mxu1 }
 0x1b4   : > { %1950 = vst [vmem:[%s3130_s8 + $0x130] sm:$0xff] %v1822_v17  ;;  %2014 = vst [vmem:[%s3130_s8 + $0x330] sm:$0xff] %v1886_v18  ;;  %v1429_v21 = vadd.f32 %v3120_v59, %v1428_v19  ;;  %v1685_v22 = vadd.f32 %v3120_v59, %v1684_v20 }
 0x1b5   : > { %v1430_v23 = vpop.f32.mrf.mxu0  ;;  %v1686_v24 = vpop.f32.mrf.mxu1 }
 0x1b6   : > { %v1823_v25 = vmax.f32 %v1429_v21, 0.0  ;;  %v1887_v26 = vmax.f32 %v1685_v22, 0.0 }
 0x1b7   : > { %v1433_v27 = vpop.f32.mrf.mxu0  ;;  %v1689_v28 = vpop.f32.mrf.mxu1 }
 0x1b8   : > { %1951 = vst [vmem:[%s3130_s8 + $0x138] sm:$0xff] %v1823_v25  ;;  %2015 = vst [vmem:[%s3130_s8 + $0x338] sm:$0xff] %v1887_v26  ;;  %v1434_v29 = vadd.f32 %v3120_v59, %v1433_v27  ;;  %v1690_v30 = vadd.f32 %v3120_v59, %v1689_v28 }
 0x1b9   : > { %v1435_v31 = vpop.f32.mrf.mxu0  ;;  %v1691_v32 = vpop.f32.mrf.mxu1 }
 0x1ba   : > { %v1824_v33 = vmax.f32 %v1434_v29, 0.0  ;;  %v1888_v34 = vmax.f32 %v1690_v30, 0.0 }
 0x1bb   : > { %v1436_v35 = vpop.f32.mrf.mxu0  ;;  %v1692_v36 = vpop.f32.mrf.mxu1 }
 0x1bc   : > { %1952 = vst [vmem:[%s3130_s8 + $0x140] sm:$0xff] %v1824_v33  ;;  %2016 = vst [vmem:[%s3130_s8 + $0x340] sm:$0xff] %v1888_v34  ;;  %v1437_v37 = vadd.f32 %v3120_v59, %v1436_v35  ;;  %v1693_v38 = vadd.f32 %v3120_v59, %v1692_v36 }
 0x1bd   : > { %v1438_v39 = vpop.f32.mrf.mxu0  ;;  %v1694_v40 = vpop.f32.mrf.mxu1 }
 0x1be   : > { %v1825_v41 = vmax.f32 %v1437_v37, 0.0  ;;  %v1889_v42 = vmax.f32 %v1693_v38, 0.0 }
 0x1bf   : > { %v1441_v43 = vpop.f32.mrf.mxu0  ;;  %v1697_v44 = vpop.f32.mrf.mxu1 }
 0x1c0   : > { %1953 = vst [vmem:[%s3130_s8 + $0x148] sm:$0xff] %v1825_v41  ;;  %2017 = vst [vmem:[%s3130_s8 + $0x348] sm:$0xff] %v1889_v42  ;;  %v1442_v45 = vadd.f32 %v3120_v59, %v1441_v43  ;;  %v1698_v46 = vadd.f32 %v3120_v59, %v1697_v44 }
 0x1c1   : > { %v1443_v47 = vpop.f32.mrf.mxu0  ;;  %v1699_v48 = vpop.f32.mrf.mxu1 }
 0x1c2   : > { %v1826_v49 = vmax.f32 %v1442_v45, 0.0  ;;  %v1890_v50 = vmax.f32 %v1698_v46, 0.0 }
 0x1c3   : > { %v1444_v51 = vpop.f32.mrf.mxu0  ;;  %v1700_v52 = vpop.f32.mrf.mxu1 }
 0x1c4   : > { %1954 = vst [vmem:[%s3130_s8 + $0x150] sm:$0xff] %v1826_v49  ;;  %2018 = vst [vmem:[%s3130_s8 + $0x350] sm:$0xff] %v1890_v50  ;;  %v1445_v53 = vadd.f32 %v3120_v59, %v1444_v51  ;;  %v1701_v54 = vadd.f32 %v3120_v59, %v1700_v52 }
 0x1c5   : > { %v1446_v55 = vpop.f32.mrf.mxu0  ;;  %v1702_v56 = vpop.f32.mrf.mxu1 }
 0x1c6   : > { %v1827_v57 = vmax.f32 %v1445_v53, 0.0  ;;  %v1891_v58 = vmax.f32 %v1701_v54, 0.0 }
 0x1c7   : > { %v1449_v60 = vpop.f32.mrf.mxu0  ;;  %v1705_v61 = vpop.f32.mrf.mxu1 }
 0x1c8   : > { %1955 = vst [vmem:[%s3130_s8 + $0x158] sm:$0xff] %v1827_v57  ;;  %2019 = vst [vmem:[%s3130_s8 + $0x358] sm:$0xff] %v1891_v58  ;;  %v1450_v62 = vadd.f32 %v3120_v59, %v1449_v60  ;;  %v1706_v63 = vadd.f32 %v3120_v59, %v1705_v61 }
 0x1c9   : > { %v1451_v0 = vpop.f32.mrf.mxu0  ;;  %v1707_v1 = vpop.f32.mrf.mxu1 }
 0x1ca   : > { %v1828_v2 = vmax.f32 %v1450_v62, 0.0  ;;  %v1892_v3 = vmax.f32 %v1706_v63, 0.0 }
 0x1cb   : > { %v1452_v4 = vpop.f32.mrf.mxu0  ;;  %v1708_v5 = vpop.f32.mrf.mxu1 }
 0x1cc   : > { %1956 = vst [vmem:[%s3130_s8 + $0x160] sm:$0xff] %v1828_v2  ;;  %2020 = vst [vmem:[%s3130_s8 + $0x360] sm:$0xff] %v1892_v3  ;;  %v1453_v6 = vadd.f32 %v3120_v59, %v1452_v4  ;;  %v1709_v8 = vadd.f32 %v3350_v7, %v1708_v5 }
 0x1cd   : > { %v1454_v9 = vpop.f32.mrf.mxu0  ;;  %v1710_v10 = vpop.f32.mrf.mxu1 }
 0x1ce   : > { %v1829_v11 = vmax.f32 %v1453_v6, 0.0  ;;  %v1893_v12 = vmax.f32 %v1709_v8, 0.0 }
 0x1cf   : > { %v1457_v13 = vpop.f32.mrf.mxu0  ;;  %v1713_v14 = vpop.f32.mrf.mxu1 }
 0x1d0   : > { %1957 = vst [vmem:[%s3130_s8 + $0x168] sm:$0xff] %v1829_v11  ;;  %2021 = vst [vmem:[%s3130_s8 + $0x368] sm:$0xff] %v1893_v12  ;;  %v1458_v15 = vadd.f32 %v3350_v7, %v1457_v13  ;;  %v1714_v59 = vadd.f32 %v3350_v7, %v1713_v14 }
 0x1d1   : > { %v1459_v16 = vpop.f32.mrf.mxu0  ;;  %v1715_v17 = vpop.f32.mrf.mxu1 }
 0x1d2   : > { %v1830_v18 = vmax.f32 %v1458_v15, 0.0  ;;  %v1894_v19 = vmax.f32 %v1714_v59, 0.0 }
 0x1d3   : > { %v1460_v20 = vpop.f32.mrf.mxu0  ;;  %v1716_v21 = vpop.f32.mrf.mxu1 }
 0x1d4   : > { %1958 = vst [vmem:[%s3130_s8 + $0x170] sm:$0xff] %v1830_v18  ;;  %2022 = vst [vmem:[%s3130_s8 + $0x370] sm:$0xff] %v1894_v19  ;;  %v1461_v22 = vadd.f32 %v3350_v7, %v1460_v20  ;;  %v1717_v23 = vadd.f32 %v3350_v7, %v1716_v21 }
 0x1d5   : > { %v1462_v24 = vpop.f32.mrf.mxu0  ;;  %v1718_v25 = vpop.f32.mrf.mxu1 }
 0x1d6   : > { %v1831_v26 = vmax.f32 %v1461_v22, 0.0  ;;  %v1895_v27 = vmax.f32 %v1717_v23, 0.0 }
 0x1d7   : > { %v1465_v28 = vpop.f32.mrf.mxu0  ;;  %v1721_v29 = vpop.f32.mrf.mxu1 }
 0x1d8   : > { %1959 = vst [vmem:[%s3130_s8 + $0x178] sm:$0xff] %v1831_v26  ;;  %2023 = vst [vmem:[%s3130_s8 + $0x378] sm:$0xff] %v1895_v27  ;;  %v1466_v30 = vadd.f32 %v3350_v7, %v1465_v28  ;;  %v1722_v31 = vadd.f32 %v3350_v7, %v1721_v29 }
 0x1d9   : > { %v1467_v32 = vpop.f32.mrf.mxu0  ;;  %v1723_v33 = vpop.f32.mrf.mxu1 }
 0x1da   : > { %v1832_v34 = vmax.f32 %v1466_v30, 0.0  ;;  %v1896_v35 = vmax.f32 %v1722_v31, 0.0 }
 0x1db   : > { %v1468_v36 = vpop.f32.mrf.mxu0  ;;  %v1724_v37 = vpop.f32.mrf.mxu1 }
 0x1dc   : > { %1960 = vst [vmem:[%s3130_s8 + $0x180] sm:$0xff] %v1832_v34  ;;  %2024 = vst [vmem:[%s3130_s8 + $0x380] sm:$0xff] %v1896_v35  ;;  %v1469_v38 = vadd.f32 %v3350_v7, %v1468_v36  ;;  %v1725_v39 = vadd.f32 %v3350_v7, %v1724_v37 }
 0x1dd   : > { %v1470_v40 = vpop.f32.mrf.mxu0  ;;  %v1726_v41 = vpop.f32.mrf.mxu1 }
 0x1de   : > { %v1833_v42 = vmax.f32 %v1469_v38, 0.0  ;;  %v1897_v43 = vmax.f32 %v1725_v39, 0.0 }
 0x1df   : > { %v1473_v44 = vpop.f32.mrf.mxu0  ;;  %v1729_v45 = vpop.f32.mrf.mxu1 }
 0x1e0   : > { %1961 = vst [vmem:[%s3130_s8 + $0x188] sm:$0xff] %v1833_v42  ;;  %2025 = vst [vmem:[%s3130_s8 + $0x388] sm:$0xff] %v1897_v43  ;;  %v1474_v46 = vadd.f32 %v3350_v7, %v1473_v44  ;;  %v1730_v47 = vadd.f32 %v3350_v7, %v1729_v45 }
 0x1e1   : > { %v1475_v48 = vpop.f32.mrf.mxu0  ;;  %v1731_v49 = vpop.f32.mrf.mxu1 }
 0x1e2   : > { %v1834_v50 = vmax.f32 %v1474_v46, 0.0  ;;  %v1898_v51 = vmax.f32 %v1730_v47, 0.0 }
 0x1e3   : > { %v1476_v52 = vpop.f32.mrf.mxu0  ;;  %v1732_v53 = vpop.f32.mrf.mxu1 }
 0x1e4   : > { %1962 = vst [vmem:[%s3130_s8 + $0x190] sm:$0xff] %v1834_v50  ;;  %2026 = vst [vmem:[%s3130_s8 + $0x390] sm:$0xff] %v1898_v51  ;;  %v1477_v54 = vadd.f32 %v3350_v7, %v1476_v52  ;;  %v1733_v55 = vadd.f32 %v3350_v7, %v1732_v53 }
 0x1e5   : > { %v1478_v56 = vpop.f32.mrf.mxu0  ;;  %v1734_v57 = vpop.f32.mrf.mxu1 }
 0x1e6   : > { %v1835_v58 = vmax.f32 %v1477_v54, 0.0  ;;  %v1899_v60 = vmax.f32 %v1733_v55, 0.0 }
 0x1e7   : > { %v1481_v61 = vpop.f32.mrf.mxu0  ;;  %v1737_v62 = vpop.f32.mrf.mxu1 }
 0x1e8   : > { %1963 = vst [vmem:[%s3130_s8 + $0x198] sm:$0xff] %v1835_v58  ;;  %2027 = vst [vmem:[%s3130_s8 + $0x398] sm:$0xff] %v1899_v60  ;;  %v1482_v63 = vadd.f32 %v3350_v7, %v1481_v61  ;;  %v1738_v0 = vadd.f32 %v3350_v7, %v1737_v62 }
 0x1e9   : > { %v1483_v1 = vpop.f32.mrf.mxu0  ;;  %v1739_v2 = vpop.f32.mrf.mxu1 }
 0x1ea   : > { %v1836_v3 = vmax.f32 %v1482_v63, 0.0  ;;  %v1900_v4 = vmax.f32 %v1738_v0, 0.0 }
 0x1eb   : > { %v1484_v5 = vpop.f32.mrf.mxu0  ;;  %v1740_v6 = vpop.f32.mrf.mxu1 }
 0x1ec   : > { %1964 = vst [vmem:[%s3130_s8 + $0x1a0] sm:$0xff] %v1836_v3  ;;  %2028 = vst [vmem:[%s3130_s8 + $0x3a0] sm:$0xff] %v1900_v4  ;;  %v1485_v8 = vadd.f32 %v3350_v7, %v1484_v5  ;;  %v1741_v9 = vadd.f32 %v3350_v7, %v1740_v6 }
 0x1ed   : > { %v1486_v10 = vpop.f32.mrf.mxu0  ;;  %v1742_v11 = vpop.f32.mrf.mxu1 }
 0x1ee   : > { %v1837_v12 = vmax.f32 %v1485_v8, 0.0  ;;  %v1901_v13 = vmax.f32 %v1741_v9, 0.0 }
 0x1ef   : > { %v1489_v14 = vpop.f32.mrf.mxu0  ;;  %v1745_v15 = vpop.f32.mrf.mxu1 }
 0x1f0   : > { %1965 = vst [vmem:[%s3130_s8 + $0x1a8] sm:$0xff] %v1837_v12  ;;  %2029 = vst [vmem:[%s3130_s8 + $0x3a8] sm:$0xff] %v1901_v13  ;;  %v1490_v59 = vadd.f32 %v3350_v7, %v1489_v14  ;;  %v1746_v16 = vadd.f32 %v3350_v7, %v1745_v15 }
 0x1f1   : > { %v1491_v17 = vpop.f32.mrf.mxu0  ;;  %v1747_v18 = vpop.f32.mrf.mxu1 }
 0x1f2   : > { %v1838_v19 = vmax.f32 %v1490_v59, 0.0  ;;  %v1902_v20 = vmax.f32 %v1746_v16, 0.0 }
 0x1f3   : > { %v1492_v21 = vpop.f32.mrf.mxu0  ;;  %v1748_v22 = vpop.f32.mrf.mxu1 }
 0x1f4   : > { %1966 = vst [vmem:[%s3130_s8 + $0x1b0] sm:$0xff] %v1838_v19  ;;  %2030 = vst [vmem:[%s3130_s8 + $0x3b0] sm:$0xff] %v1902_v20  ;;  %v1493_v23 = vadd.f32 %v3350_v7, %v1492_v21  ;;  %v1749_v24 = vadd.f32 %v3350_v7, %v1748_v22 }
 0x1f5   : > { %v1494_v25 = vpop.f32.mrf.mxu0  ;;  %v1750_v26 = vpop.f32.mrf.mxu1 }
 0x1f6   : > { %v1839_v27 = vmax.f32 %v1493_v23, 0.0  ;;  %v1903_v28 = vmax.f32 %v1749_v24, 0.0 }
 0x1f7   : > { %v1497_v29 = vpop.f32.mrf.mxu0  ;;  %v1753_v30 = vpop.f32.mrf.mxu1 }
 0x1f8   : > { %1967 = vst [vmem:[%s3130_s8 + $0x1b8] sm:$0xff] %v1839_v27  ;;  %2031 = vst [vmem:[%s3130_s8 + $0x3b8] sm:$0xff] %v1903_v28  ;;  %v1498_v31 = vadd.f32 %v3350_v7, %v1497_v29  ;;  %v1754_v32 = vadd.f32 %v3350_v7, %v1753_v30 }
 0x1f9   : > { %v1499_v33 = vpop.f32.mrf.mxu0  ;;  %v1755_v34 = vpop.f32.mrf.mxu1 }
 0x1fa   : > { %v1840_v35 = vmax.f32 %v1498_v31, 0.0  ;;  %v1904_v36 = vmax.f32 %v1754_v32, 0.0 }
 0x1fb   : > { %v1500_v37 = vpop.f32.mrf.mxu0  ;;  %v1756_v38 = vpop.f32.mrf.mxu1 }
 0x1fc   : > { %1968 = vst [vmem:[%s3130_s8 + $0x1c0] sm:$0xff] %v1840_v35  ;;  %2032 = vst [vmem:[%s3130_s8 + $0x3c0] sm:$0xff] %v1904_v36  ;;  %v1501_v39 = vadd.f32 %v3350_v7, %v1500_v37  ;;  %v1757_v40 = vadd.f32 %v3350_v7, %v1756_v38 }
 0x1fd   : > { %v1502_v41 = vpop.f32.mrf.mxu0  ;;  %v1758_v42 = vpop.f32.mrf.mxu1 }
 0x1fe   : > { %v1841_v43 = vmax.f32 %v1501_v39, 0.0  ;;  %v1905_v44 = vmax.f32 %v1757_v40, 0.0 }
 0x1ff   : > { %v1505_v45 = vpop.f32.mrf.mxu0  ;;  %v1761_v46 = vpop.f32.mrf.mxu1 }
 0x200   : > { %1969 = vst [vmem:[%s3130_s8 + $0x1c8] sm:$0xff] %v1841_v43  ;;  %2033 = vst [vmem:[%s3130_s8 + $0x3c8] sm:$0xff] %v1905_v44  ;;  %v1506_v47 = vadd.f32 %v3350_v7, %v1505_v45  ;;  %v1762_v48 = vadd.f32 %v3350_v7, %v1761_v46 }
 0x201   : > { %v1507_v49 = vpop.f32.mrf.mxu0  ;;  %v1763_v50 = vpop.f32.mrf.mxu1 }
 0x202   : > { %v1842_v51 = vmax.f32 %v1506_v47, 0.0  ;;  %v1906_v52 = vmax.f32 %v1762_v48, 0.0 }
 0x203   : > { %v1508_v53 = vpop.f32.mrf.mxu0  ;;  %v1764_v54 = vpop.f32.mrf.mxu1 }
 0x204   : > { %1970 = vst [vmem:[%s3130_s8 + $0x1d0] sm:$0xff] %v1842_v51  ;;  %2034 = vst [vmem:[%s3130_s8 + $0x3d0] sm:$0xff] %v1906_v52  ;;  %v1509_v55 = vadd.f32 %v3350_v7, %v1508_v53  ;;  %v1765_v56 = vadd.f32 %v3350_v7, %v1764_v54 }
 0x205   : > { %v1510_v57 = vpop.f32.mrf.mxu0  ;;  %v1766_v58 = vpop.f32.mrf.mxu1 }
 0x206   : > { %v1843_v60 = vmax.f32 %v1509_v55, 0.0  ;;  %v1907_v61 = vmax.f32 %v1765_v56, 0.0 }
 0x207   : > { %v1513_v62 = vpop.f32.mrf.mxu0  ;;  %v1769_v63 = vpop.f32.mrf.mxu1 }
 0x208   : > { %1971 = vst [vmem:[%s3130_s8 + $0x1d8] sm:$0xff] %v1843_v60  ;;  %2035 = vst [vmem:[%s3130_s8 + $0x3d8] sm:$0xff] %v1907_v61  ;;  %v1514_v0 = vadd.f32 %v3350_v7, %v1513_v62  ;;  %v1770_v1 = vadd.f32 %v3350_v7, %v1769_v63 }
 0x209   : > { %v1515_v2 = vpop.f32.mrf.mxu0  ;;  %v1771_v3 = vpop.f32.mrf.mxu1 }
 0x20a   : > { %v1844_v4 = vmax.f32 %v1514_v0, 0.0  ;;  %v1908_v5 = vmax.f32 %v1770_v1, 0.0 }
 0x20b   : > { %v1516_v6 = vpop.f32.mrf.mxu0  ;;  %v1772_v8 = vpop.f32.mrf.mxu1 }
 0x20c   : > { %1972 = vst [vmem:[%s3130_s8 + $0x1e0] sm:$0xff] %v1844_v4  ;;  %2036 = vst [vmem:[%s3130_s8 + $0x3e0] sm:$0xff] %v1908_v5  ;;  %v1517_v9 = vadd.f32 %v3350_v7, %v1516_v6  ;;  %v1773_v10 = vadd.f32 %v3350_v7, %v1772_v8 }
 0x20d   : > { %v1518_v11 = vpop.f32.mrf.mxu0  ;;  %v1774_v12 = vpop.f32.mrf.mxu1 }
 0x20e   : > { %v1845_v13 = vmax.f32 %v1517_v9, 0.0  ;;  %v1909_v14 = vmax.f32 %v1773_v10, 0.0 }
 0x20f   : > { %v1521_v15 = vpop.f32.mrf.mxu0  ;;  %v1777_v59 = vpop.f32.mrf.mxu1 }
 0x210   : > { %1973 = vst [vmem:[%s3130_s8 + $0x1e8] sm:$0xff] %v1845_v13  ;;  %2037 = vst [vmem:[%s3130_s8 + $0x3e8] sm:$0xff] %v1909_v14  ;;  %v1522_v16 = vadd.f32 %v3350_v7, %v1521_v15  ;;  %v1778_v17 = vadd.f32 %v3350_v7, %v1777_v59 }
 0x211   : > { %v1523_v18 = vpop.f32.mrf.mxu0  ;;  %v1779_v19 = vpop.f32.mrf.mxu1 }
 0x212   : > { %v1846_v20 = vmax.f32 %v1522_v16, 0.0  ;;  %v1910_v21 = vmax.f32 %v1778_v17, 0.0 }
 0x213   : > { %v1524_v22 = vpop.f32.mrf.mxu0  ;;  %v1780_v23 = vpop.f32.mrf.mxu1 }
 0x214   : > { %1974 = vst [vmem:[%s3130_s8 + $0x1f0] sm:$0xff] %v1846_v20  ;;  %2038 = vst [vmem:[%s3130_s8 + $0x3f0] sm:$0xff] %v1910_v21  ;;  %v1525_v24 = vadd.f32 %v3350_v7, %v1524_v22  ;;  %v1781_v25 = vadd.f32 %v3350_v7, %v1780_v23 }
 0x215   : > { %v1526_v26 = vpop.f32.mrf.mxu0  ;;  %v1782_v27 = vpop.f32.mrf.mxu1 }
 0x216   : > { %v1847_v28 = vmax.f32 %v1525_v24, 0.0  ;;  %v1911_v29 = vmax.f32 %v1781_v25, 0.0 }
 0x218   : > { %1975 = vst [vmem:[%s3130_s8 + $0x1f8] sm:$0xff] %v1847_v28  ;;  %2039 = vst [vmem:[%s3130_s8 + $0x3f8] sm:$0xff] %v1911_v29 }
 0x219   : > { %2695 = shalt.err (!%p2692_p7)
}
 0x21a   : > { %s2696_s4 = scalar_lea.hbm %s3427_s15, 16384  ;;  %s2700_s9 = scalar_lea.hbm %s3493_s3, 131072 }
 0x21b   : > { %p2697_p9 = scmp.ne.s32.totalorder %s3427_s15, %s2696_s4  ;;  %p2701_p12 = scmp.lt.s32.totalorder %s3427_s15, %s3493_s3 }
 0x21c   : > { %p2702_p13 = scmp.lt.s32.totalorder %s2700_s9, %s2696_s4 }
 0x21d   : > { %p2698_p10 = pnand %p2697_p9, %p2852_p3 }
 0x21e   : > { %p2703_p0 = por %p2702_p13, %p2701_p12 }
 0x21f   : > { %p2699_p11 = pneg %p2698_p10 }
 0x221   : > { %p2704_p1 = pnand %p2703_p0, %p2699_p11 }
 0x223   : > { %2707 = shalt.err (!%p2704_p1)
}
 0x224   : > { %s2779_s16 = smov 128   ;;  %s2780_s24 = smov 8  }
 0x225   : > { %2398 = dma.vmem_to_hbm [thread:$0]  (%p2852_p3), %s3433_s10, 16384, %s3427_s15, %s3439_s28, %s2779_s16, %s2779_s16, %s2780_s24  }
 0x226 PF: > { %p2404_p2 = scmp.ge.s32.totalorder %s2774_s19, 2  ;;  %s2071_s27 = sand.u32 1, %s2746_s12  }
 0x227   : > { %s2072_s29 = scalar_lea.sflag [#allocation3], %s2071_s27 }
 0x228   : > { %p2401_p4 = pnand %p2404_p2, %p2861_p8 }
 0x22a   : > { %p2402_p5 = pneg %p2401_p4 }
 0x22c   : > { %2741 = dma.done.wait (%p2402_p5), %s2072_s29, 16384  }
 0x22d   : > { %2743 = vsyncadd (%p2402_p5), %s2072_s29, 4294950912  ;;  %s16_s19 = sadd.s32 1, %s2774_s19   ;;  %s3496_s12 = smov %s2750_s13 }
 0x22e   : > { %p13_p6 = scmp.ge.s32.totalorder %s16_s19, 10   ;;  %s3497_s13 = smov %s2754_s14 }
 0x22f   : > { %s3498_s14 = smov %s2870_s30  ;;  %s3499_s15 = smov %s2766_s17 }
 0x230   : > { %s3500_s16 = smov %s2770_s18  ;;  %s3501_s17 = smov %s3504_s22 }
 0x231   : > { %s3502_s18 = smov %s3508_s23  ;;  %15 = sbr.rel (!%p13_p6) target bundleno = 5 (0x5), region = 67 }
 0x236   :  { %2077 = vsyncpa [#allocation3], 1 }
 0x237   :  { %2079 = vsyncpa [#allocation3 + $0x1], 1 }

</bundles_post_ra>
